<compile_context>
chip_gen: v5e
topology: v5e:2x2
jax: 0.10.0
libtpu: 0.0.40
codegen_flags: <defaults>
</compile_context>

<pallas_src>
import numpy as np
import jax
import jax.numpy as jnp
from jax import lax
from jax.experimental import pallas as pl
from jax.experimental.pallas import tpu as pltpu

# ----------------------------------------------------------------------------
# Small config consistent with rODTForestConstruction (n_head defaults to 1).
# ----------------------------------------------------------------------------
N_COL = 4
N_COND = 4
N_RODT = 8                 # R (groups / rODTs)
N_ESTIMATOR = 4            # E (estimators sampled per forest)
N_FOREST = 16              # F
N_HEAD = 1                 # TODO(synk): n_head > 1 multi-head split not implemented in-kernel
N_HIDDEN = 32
BATCH = 4
C = N_COND * N_COL         # channels entering phi_2
CPG = C // N_RODT          # channels per group
RH = N_RODT * N_HEAD
FE = N_FOREST * N_ESTIMATOR
EPS = 1e-5


def _forest_kernel(x_ref, m_ref, w1_ref, w2_ref, prm_ref, st_ref, eg_ref, out_ref):
    x = x_ref[...]                                               # (b, C)
    m = m_ref[...]                                               # (C, C) group-avg matrix
    prm = prm_ref[...]                                           # (6, C) packed params
    g1w, g1b, b1 = prm[0:1, :], prm[1:2, :], prm[2:3, :]
    g2w, g2b = prm[3:4, :], prm[4:5, :]
    b2 = prm[5:6, :RH]

    def group_norm(v, gamma, beta):
        # Two-pass variance (matches GroupNorm numerics; avoids E[x^2]-mu^2
        # cancellation that broke the previous version's tolerance check).
        mu = jnp.dot(v, m, preferred_element_type=jnp.float32)
        d = v - mu
        var = jnp.dot(d * d, m, preferred_element_type=jnp.float32)
        return d * lax.rsqrt(var + EPS) * gamma + beta

    # ---- phi_2: GroupNorm -> grouped 1x1 conv -> ReLU -> GroupNorm -> conv ----
    h = group_norm(x, g1w, g1b)
    h = jnp.dot(h, w1_ref[...], preferred_element_type=jnp.float32) + b1
    h = jnp.maximum(h, 0.0)
    h = group_norm(h, g2w, g2b)
    w = jnp.dot(h, w2_ref[...], preferred_element_type=jnp.float32) + b2    # (b, RH)

    # ---- gather rODT weights for all forests at once (one-hot matmul) ----
    wg_all = jnp.dot(w, st_ref[...], preferred_element_type=jnp.float32)   # (b, F*E)
    eg_all = eg_ref[...]                                                    # (F*E, hidden)

    # ---- per-forest softmax over estimators + weighted aggregation,
    #      unrolled static loop on VMEM-resident data, single slab store ----
    pieces = []
    for f in range(N_FOREST):
        lo = f * N_ESTIMATOR
        wg_f = wg_all[:, lo:lo + N_ESTIMATOR]                               # (b, E)
        wg_f = wg_f - jnp.max(wg_f, axis=-1, keepdims=True)
        p = jnp.exp(wg_f)
        w_sm = p / jnp.sum(p, axis=-1, keepdims=True)                       # softmax over E
        eg_f = eg_all[lo:lo + N_ESTIMATOR, :]                               # (E, hidden)
        pieces.append(jnp.dot(w_sm, eg_f, preferred_element_type=jnp.float32))
    out_ref[...] = jnp.concatenate(pieces, axis=-1)                         # (b, F*hidden)


def rodt_forest_construction(O, M, W1t, W2t, params, St_all, Eg):
    x = O[:, :, 0]                       # squeeze Conv1d length dim (L = 1)
    b = x.shape[0]

    out = pl.pallas_call(
        _forest_kernel,
        out_shape=jax.ShapeDtypeStruct((b, N_FOREST * N_HIDDEN), jnp.float32),
        grid=(1,),
        in_specs=[
            pl.BlockSpec((b, C), lambda i: (0, 0)),            # O (batch, channels)
            pl.BlockSpec((C, C), lambda i: (0, 0)),            # group-averaging matrix
            pl.BlockSpec((C, C), lambda i: (0, 0)),            # conv1 block-diag weights (in, out)
            pl.BlockSpec((C, RH), lambda i: (0, 0)),           # conv2 block-diag weights (in, out)
            pl.BlockSpec((6, C), lambda i: (0, 0)),            # packed gamma/beta/bias vectors
            pl.BlockSpec((N_RODT, FE), lambda i: (0, 0)),      # one-hot gather matrix St
            pl.BlockSpec((FE, N_HIDDEN), lambda i: (0, 0)),    # gathered embeddings E[sample]
        ],
        out_specs=pl.BlockSpec((b, N_FOREST * N_HIDDEN), lambda i: (0, 0)),
        compiler_params=pltpu.CompilerParams(dimension_semantics=("arbitrary",)),
    )(x, M, W1t, W2t, params, St_all, Eg)

    return out.reshape(b, N_FOREST, N_HIDDEN)    # (b, n_forest, n_hidden)


# ----------------------------------------------------------------------------
# Pure-JAX reference of the PyTorch forward (eval mode, dropout = 0).
# ----------------------------------------------------------------------------
def reference_forward(O, g1w, g1b, W1, b1, g2w, g2b, W2, b2, E_w, sample):
    b = O.shape[0]
    x = O[:, :, 0]

    def gnorm(v, gamma, beta):
        vg = v.reshape(b, N_RODT, CPG)
        mu = vg.mean(-1, keepdims=True)
        var = ((vg - mu) ** 2).mean(-1, keepdims=True)
        vn = ((vg - mu) / jnp.sqrt(var + EPS)).reshape(b, C)
        return vn * gamma[None, :] + beta[None, :]

    h = gnorm(x, g1w, g1b)
    h = jnp.einsum('goi,bgi->bgo', W1, h.reshape(b, N_RODT, CPG)).reshape(b, C) + b1[None]
    h = jnp.maximum(h, 0.0)
    h = gnorm(h, g2w, g2b)
    w = jnp.einsum('ghi,bgi->bgh', W2, h.reshape(b, N_RODT, CPG)).reshape(b, RH) + b2[None]
    w = w.reshape(b, N_RODT, N_HEAD)

    wg = w[:, sample]                                    # (b, F, E, H)
    w_sm = jax.nn.softmax(wg, axis=-2)[..., None]        # (b, F, E, H, 1)
    Eg = E_w[sample].reshape(1, N_FOREST, N_ESTIMATOR, N_HEAD, N_HIDDEN // N_HEAD)
    return (w_sm * Eg).sum(-3).reshape(b, N_FOREST, N_HIDDEN)


if __name__ == "__main__":
    key = jax.random.PRNGKey(0)
    ks = jax.random.split(key, 13)

    # Deterministic synthetic parameters (shapes from the module's __init__).
    g1w = jax.random.normal(ks[0], (C,), jnp.float32) * 0.5 + 1.0
    g1b = jax.random.normal(ks[1], (C,), jnp.float32) * 0.1
    W1 = jax.random.normal(ks[2], (N_RODT, CPG, CPG), jnp.float32) / np.sqrt(CPG)
    b1 = jax.random.normal(ks[3], (C,), jnp.float32) * 0.1
    g2w = jax.random.normal(ks[4], (C,), jnp.float32) * 0.5 + 1.0
    g2b = jax.random.normal(ks[5], (C,), jnp.float32) * 0.1
    W2 = jax.random.normal(ks[6], (N_RODT, N_HEAD, CPG), jnp.float32) / np.sqrt(CPG)
    b2 = jax.random.normal(ks[7], (RH,), jnp.float32) * 0.1
    E_w = jax.random.normal(ks[8], (N_RODT, N_HIDDEN), jnp.float32)
    # eval-mode sample_without_replacement: rand(F, R).argsort(-1)[:, :E]
    sample = jnp.argsort(jax.random.uniform(ks[9], (N_FOREST, N_RODT)), axis=-1)[:, :N_ESTIMATOR]
    O = jax.random.normal(ks[10], (BATCH, C, 1), jnp.float32)

    # --- glue (parameter prep, not hot path): dense block-diagonal conv
    #     weights, group-mean matrix, one-hot gather matrix, gathered
    #     embeddings E[sample], and the packed per-channel parameter block ---
    W1_np = np.asarray(W1)
    W2_np = np.asarray(W2)
    W1t = np.zeros((C, C), np.float32)           # [in, out]
    W2t = np.zeros((C, RH), np.float32)          # [in, out]
    M = np.zeros((C, C), np.float32)             # group-averaging matrix
    for g in range(N_RODT):
        W1t[g * CPG:(g + 1) * CPG, g * CPG:(g + 1) * CPG] = W1_np[g].T
        W2t[g * CPG:(g + 1) * CPG, g * N_HEAD:(g + 1) * N_HEAD] = W2_np[g].T
        M[g * CPG:(g + 1) * CPG, g * CPG:(g + 1) * CPG] = 1.0 / CPG

    sample_np = np.asarray(sample)
    St_all = np.zeros((N_RODT, FE), np.float32)   # one-hot: wg = w @ St_all gathers w[:, sample]
    for f in range(N_FOREST):
        for e in range(N_ESTIMATOR):
            St_all[sample_np[f, e], f * N_ESTIMATOR + e] = 1.0
    Eg = np.asarray(E_w)[sample_np.reshape(-1)]   # (F*E, hidden), hoisted S @ E

    params = np.zeros((6, C), np.float32)         # packed small vectors -> one DMA
    params[0] = np.asarray(g1w)
    params[1] = np.asarray(g1b)
    params[2] = np.asarray(b1)
    params[3] = np.asarray(g2w)
    params[4] = np.asarray(g2b)
    params[5, :RH] = np.asarray(b2)

    out = rodt_forest_construction(
        O,
        jnp.asarray(M), jnp.asarray(W1t), jnp.asarray(W2t),
        jnp.asarray(params), jnp.asarray(St_all), jnp.asarray(Eg),
    )
    out = jax.block_until_ready(out)

    ref = reference_forward(O, g1w, g1b, W1, b1, g2w, g2b, W2, b2, E_w, sample)
    ref = jax.block_until_ready(ref)

    assert out.shape == (BATCH, N_FOREST, N_HIDDEN), out.shape
    np.testing.assert_allclose(np.asarray(out), np.asarray(ref), rtol=1e-4, atol=1e-4)
    print("KERNEL_OK")
</pallas_src>

<mosaic_0001>
module attributes {stable_mosaic.version = 11 : i64} {
  func.func @_forest_kernel(%arg0: i32, %arg1: memref<4x16xf32, #tpu.memory_space<vmem>>, %arg2: memref<16x16xf32, #tpu.memory_space<vmem>>, %arg3: memref<16x16xf32, #tpu.memory_space<vmem>>, %arg4: memref<16x8xf32, #tpu.memory_space<vmem>>, %arg5: memref<6x16xf32, #tpu.memory_space<vmem>>, %arg6: memref<8x64xf32, #tpu.memory_space<vmem>>, %arg7: memref<64x32xf32, #tpu.memory_space<vmem>>, %arg8: memref<4x512xf32, #tpu.memory_space<vmem>>) attributes {dimension_semantics = [#tpu.dimension_semantics<arbitrary>], iteration_bounds = array<i64: 1>, scalar_prefetch = 0 : i64, scratch_operands = 0 : i64, tpu.core_type = #tpu.core_type<tc>, window_params = [{pipeline_mode = #tpu.pipeline_mode<synchronous>, transform_indices = @transform_0, window_bounds = array<i64: 4, 16>}, {pipeline_mode = #tpu.pipeline_mode<synchronous>, transform_indices = @transform_1, window_bounds = array<i64: 16, 16>}, {pipeline_mode = #tpu.pipeline_mode<synchronous>, transform_indices = @transform_2, window_bounds = array<i64: 16, 16>}, {pipeline_mode = #tpu.pipeline_mode<synchronous>, transform_indices = @transform_3, window_bounds = array<i64: 16, 8>}, {pipeline_mode = #tpu.pipeline_mode<synchronous>, transform_indices = @transform_4, window_bounds = array<i64: 6, 16>}, {pipeline_mode = #tpu.pipeline_mode<synchronous>, transform_indices = @transform_5, window_bounds = array<i64: 8, 64>}, {pipeline_mode = #tpu.pipeline_mode<synchronous>, transform_indices = @transform_6, window_bounds = array<i64: 64, 32>}, {pipeline_mode = #tpu.pipeline_mode<synchronous>, transform_indices = @transform_7, window_bounds = array<i64: 4, 512>}]} {
    %c0 = arith.constant 0 : index
    %c0_0 = arith.constant 0 : index
    %0 = vector.load %arg1[%c0, %c0_0] : memref<4x16xf32, #tpu.memory_space<vmem>>, vector<4x16xf32>
    %c0_1 = arith.constant 0 : index
    %c0_2 = arith.constant 0 : index
    %1 = vector.load %arg2[%c0_1, %c0_2] : memref<16x16xf32, #tpu.memory_space<vmem>>, vector<16x16xf32>
    %c0_3 = arith.constant 0 : index
    %c0_4 = arith.constant 0 : index
    %2 = vector.load %arg5[%c0_3, %c0_4] : memref<6x16xf32, #tpu.memory_space<vmem>>, vector<6x16xf32>
    %3 = vector.extract_strided_slice %2 {offsets = [0, 0], sizes = [1, 16], strides = [1, 1]} : vector<6x16xf32> to vector<1x16xf32>
    %4 = vector.extract_strided_slice %2 {offsets = [1, 0], sizes = [1, 16], strides = [1, 1]} : vector<6x16xf32> to vector<1x16xf32>
    %5 = vector.extract_strided_slice %2 {offsets = [2, 0], sizes = [1, 16], strides = [1, 1]} : vector<6x16xf32> to vector<1x16xf32>
    %6 = vector.extract_strided_slice %2 {offsets = [3, 0], sizes = [1, 16], strides = [1, 1]} : vector<6x16xf32> to vector<1x16xf32>
    %7 = vector.extract_strided_slice %2 {offsets = [4, 0], sizes = [1, 16], strides = [1, 1]} : vector<6x16xf32> to vector<1x16xf32>
    %8 = vector.extract_strided_slice %2 {offsets = [5, 0], sizes = [1, 8], strides = [1, 1]} : vector<6x16xf32> to vector<1x8xf32>
    %cst = arith.constant dense<0.000000e+00> : vector<4x16xf32>
    %9 = tpu.matmul %0, %1, %cst {dimension_numbers = #tpu.dot_dimension_numbers<[1], [0], [0], [1], [0, 0, 1, 1], [], []>} : vector<4x16xf32>, vector<16x16xf32>, vector<4x16xf32> -> vector<4x16xf32>
    %10 = arith.subf %0, %9 : vector<4x16xf32>
    %11 = arith.mulf %10, %10 : vector<4x16xf32>
    %cst_5 = arith.constant dense<0.000000e+00> : vector<4x16xf32>
    %12 = tpu.matmul %11, %1, %cst_5 {dimension_numbers = #tpu.dot_dimension_numbers<[1], [0], [0], [1], [0, 0, 1, 1], [], []>} : vector<4x16xf32>, vector<16x16xf32>, vector<4x16xf32> -> vector<4x16xf32>
    %cst_6 = arith.constant 9.99999974E-6 : f32
    %13 = vector.broadcast %cst_6 : f32 to vector<4x16xf32>
    %14 = arith.addf %12, %13 : vector<4x16xf32>
    %15 = math.rsqrt %14 : vector<4x16xf32>
    %16 = arith.mulf %10, %15 : vector<4x16xf32>
    %17 = vector.broadcast %3 : vector<1x16xf32> to vector<4x16xf32>
    %18 = arith.mulf %16, %17 : vector<4x16xf32>
    %19 = vector.broadcast %4 : vector<1x16xf32> to vector<4x16xf32>
    %20 = arith.addf %18, %19 : vector<4x16xf32>
    %c0_7 = arith.constant 0 : index
    %c0_8 = arith.constant 0 : index
    %21 = vector.load %arg3[%c0_7, %c0_8] : memref<16x16xf32, #tpu.memory_space<vmem>>, vector<16x16xf32>
    %cst_9 = arith.constant dense<0.000000e+00> : vector<4x16xf32>
    %22 = tpu.matmul %20, %21, %cst_9 {dimension_numbers = #tpu.dot_dimension_numbers<[1], [0], [0], [1], [0, 0, 1, 1], [], []>} : vector<4x16xf32>, vector<16x16xf32>, vector<4x16xf32> -> vector<4x16xf32>
    %23 = vector.broadcast %5 : vector<1x16xf32> to vector<4x16xf32>
    %24 = arith.addf %22, %23 : vector<4x16xf32>
    %cst_10 = arith.constant 0.000000e+00 : f32
    %25 = vector.broadcast %cst_10 : f32 to vector<4x16xf32>
    %26 = arith.maximumf %24, %25 : vector<4x16xf32>
    %cst_11 = arith.constant dense<0.000000e+00> : vector<4x16xf32>
    %27 = tpu.matmul %26, %1, %cst_11 {dimension_numbers = #tpu.dot_dimension_numbers<[1], [0], [0], [1], [0, 0, 1, 1], [], []>} : vector<4x16xf32>, vector<16x16xf32>, vector<4x16xf32> -> vector<4x16xf32>
    %28 = arith.subf %26, %27 : vector<4x16xf32>
    %29 = arith.mulf %28, %28 : vector<4x16xf32>
    %cst_12 = arith.constant dense<0.000000e+00> : vector<4x16xf32>
    %30 = tpu.matmul %29, %1, %cst_12 {dimension_numbers = #tpu.dot_dimension_numbers<[1], [0], [0], [1], [0, 0, 1, 1], [], []>} : vector<4x16xf32>, vector<16x16xf32>, vector<4x16xf32> -> vector<4x16xf32>
    %cst_13 = arith.constant 9.99999974E-6 : f32
    %31 = vector.broadcast %cst_13 : f32 to vector<4x16xf32>
    %32 = arith.addf %30, %31 : vector<4x16xf32>
    %33 = math.rsqrt %32 : vector<4x16xf32>
    %34 = arith.mulf %28, %33 : vector<4x16xf32>
    %35 = vector.broadcast %6 : vector<1x16xf32> to vector<4x16xf32>
    %36 = arith.mulf %34, %35 : vector<4x16xf32>
    %37 = vector.broadcast %7 : vector<1x16xf32> to vector<4x16xf32>
    %38 = arith.addf %36, %37 : vector<4x16xf32>
    %c0_14 = arith.constant 0 : index
    %c0_15 = arith.constant 0 : index
    %39 = vector.load %arg4[%c0_14, %c0_15] : memref<16x8xf32, #tpu.memory_space<vmem>>, vector<16x8xf32>
    %cst_16 = arith.constant dense<0.000000e+00> : vector<4x8xf32>
    %40 = tpu.matmul %38, %39, %cst_16 {dimension_numbers = #tpu.dot_dimension_numbers<[1], [0], [0], [1], [0, 0, 1, 1], [], []>} : vector<4x16xf32>, vector<16x8xf32>, vector<4x8xf32> -> vector<4x8xf32>
    %41 = vector.broadcast %8 : vector<1x8xf32> to vector<4x8xf32>
    %42 = arith.addf %40, %41 : vector<4x8xf32>
    %c0_17 = arith.constant 0 : index
    %c0_18 = arith.constant 0 : index
    %43 = vector.load %arg6[%c0_17, %c0_18] : memref<8x64xf32, #tpu.memory_space<vmem>>, vector<8x64xf32>
    %cst_19 = arith.constant dense<0.000000e+00> : vector<4x64xf32>
    %44 = tpu.matmul %42, %43, %cst_19 {dimension_numbers = #tpu.dot_dimension_numbers<[1], [0], [0], [1], [0, 0, 1, 1], [], []>} : vector<4x8xf32>, vector<8x64xf32>, vector<4x64xf32> -> vector<4x64xf32>
    %c0_20 = arith.constant 0 : index
    %c0_21 = arith.constant 0 : index
    %45 = vector.load %arg7[%c0_20, %c0_21] : memref<64x32xf32, #tpu.memory_space<vmem>>, vector<64x32xf32>
    %46 = vector.extract_strided_slice %44 {offsets = [0, 0], sizes = [4, 4], strides = [1, 1]} : vector<4x64xf32> to vector<4x4xf32>
    %cst_22 = arith.constant dense<0xFF800000> : vector<4xf32>
    %47 = vector.multi_reduction <maximumf>, %46, %cst_22 [1] : vector<4x4xf32> to vector<4xf32>
    %48 = vector.shape_cast %47 : vector<4xf32> to vector<4x1xf32>
    %49 = vector.broadcast %48 : vector<4x1xf32> to vector<4x4xf32>
    %50 = arith.subf %46, %49 : vector<4x4xf32>
    %51 = math.exp %50 : vector<4x4xf32>
    %cst_23 = arith.constant dense<0.000000e+00> : vector<4xf32>
    %52 = vector.multi_reduction <add>, %51, %cst_23 [1] : vector<4x4xf32> to vector<4xf32>
    %53 = vector.shape_cast %52 : vector<4xf32> to vector<4x1xf32>
    %54 = vector.broadcast %53 : vector<4x1xf32> to vector<4x4xf32>
    %55 = arith.divf %51, %54 : vector<4x4xf32>
    %56 = vector.extract_strided_slice %45 {offsets = [0, 0], sizes = [4, 32], strides = [1, 1]} : vector<64x32xf32> to vector<4x32xf32>
    %cst_24 = arith.constant dense<0.000000e+00> : vector<4x32xf32>
    %57 = tpu.matmul %55, %56, %cst_24 {dimension_numbers = #tpu.dot_dimension_numbers<[1], [0], [0], [1], [0, 0, 1, 1], [], []>} : vector<4x4xf32>, vector<4x32xf32>, vector<4x32xf32> -> vector<4x32xf32>
    %58 = vector.extract_strided_slice %44 {offsets = [0, 4], sizes = [4, 4], strides = [1, 1]} : vector<4x64xf32> to vector<4x4xf32>
    %cst_25 = arith.constant dense<0xFF800000> : vector<4xf32>
    %59 = vector.multi_reduction <maximumf>, %58, %cst_25 [1] : vector<4x4xf32> to vector<4xf32>
    %60 = vector.shape_cast %59 : vector<4xf32> to vector<4x1xf32>
    %61 = vector.broadcast %60 : vector<4x1xf32> to vector<4x4xf32>
    %62 = arith.subf %58, %61 : vector<4x4xf32>
    %63 = math.exp %62 : vector<4x4xf32>
    %cst_26 = arith.constant dense<0.000000e+00> : vector<4xf32>
    %64 = vector.multi_reduction <add>, %63, %cst_26 [1] : vector<4x4xf32> to vector<4xf32>
    %65 = vector.shape_cast %64 : vector<4xf32> to vector<4x1xf32>
    %66 = vector.broadcast %65 : vector<4x1xf32> to vector<4x4xf32>
    %67 = arith.divf %63, %66 : vector<4x4xf32>
    %68 = vector.extract_strided_slice %45 {offsets = [4, 0], sizes = [4, 32], strides = [1, 1]} : vector<64x32xf32> to vector<4x32xf32>
    %cst_27 = arith.constant dense<0.000000e+00> : vector<4x32xf32>
    %69 = tpu.matmul %67, %68, %cst_27 {dimension_numbers = #tpu.dot_dimension_numbers<[1], [0], [0], [1], [0, 0, 1, 1], [], []>} : vector<4x4xf32>, vector<4x32xf32>, vector<4x32xf32> -> vector<4x32xf32>
    %70 = vector.extract_strided_slice %44 {offsets = [0, 8], sizes = [4, 4], strides = [1, 1]} : vector<4x64xf32> to vector<4x4xf32>
    %cst_28 = arith.constant dense<0xFF800000> : vector<4xf32>
    %71 = vector.multi_reduction <maximumf>, %70, %cst_28 [1] : vector<4x4xf32> to vector<4xf32>
    %72 = vector.shape_cast %71 : vector<4xf32> to vector<4x1xf32>
    %73 = vector.broadcast %72 : vector<4x1xf32> to vector<4x4xf32>
    %74 = arith.subf %70, %73 : vector<4x4xf32>
    %75 = math.exp %74 : vector<4x4xf32>
    %cst_29 = arith.constant dense<0.000000e+00> : vector<4xf32>
    %76 = vector.multi_reduction <add>, %75, %cst_29 [1] : vector<4x4xf32> to vector<4xf32>
    %77 = vector.shape_cast %76 : vector<4xf32> to vector<4x1xf32>
    %78 = vector.broadcast %77 : vector<4x1xf32> to vector<4x4xf32>
    %79 = arith.divf %75, %78 : vector<4x4xf32>
    %80 = vector.extract_strided_slice %45 {offsets = [8, 0], sizes = [4, 32], strides = [1, 1]} : vector<64x32xf32> to vector<4x32xf32>
    %cst_30 = arith.constant dense<0.000000e+00> : vector<4x32xf32>
    %81 = tpu.matmul %79, %80, %cst_30 {dimension_numbers = #tpu.dot_dimension_numbers<[1], [0], [0], [1], [0, 0, 1, 1], [], []>} : vector<4x4xf32>, vector<4x32xf32>, vector<4x32xf32> -> vector<4x32xf32>
    %82 = vector.extract_strided_slice %44 {offsets = [0, 12], sizes = [4, 4], strides = [1, 1]} : vector<4x64xf32> to vector<4x4xf32>
    %cst_31 = arith.constant dense<0xFF800000> : vector<4xf32>
    %83 = vector.multi_reduction <maximumf>, %82, %cst_31 [1] : vector<4x4xf32> to vector<4xf32>
    %84 = vector.shape_cast %83 : vector<4xf32> to vector<4x1xf32>
    %85 = vector.broadcast %84 : vector<4x1xf32> to vector<4x4xf32>
    %86 = arith.subf %82, %85 : vector<4x4xf32>
    %87 = math.exp %86 : vector<4x4xf32>
    %cst_32 = arith.constant dense<0.000000e+00> : vector<4xf32>
    %88 = vector.multi_reduction <add>, %87, %cst_32 [1] : vector<4x4xf32> to vector<4xf32>
    %89 = vector.shape_cast %88 : vector<4xf32> to vector<4x1xf32>
    %90 = vector.broadcast %89 : vector<4x1xf32> to vector<4x4xf32>
    %91 = arith.divf %87, %90 : vector<4x4xf32>
    %92 = vector.extract_strided_slice %45 {offsets = [12, 0], sizes = [4, 32], strides = [1, 1]} : vector<64x32xf32> to vector<4x32xf32>
    %cst_33 = arith.constant dense<0.000000e+00> : vector<4x32xf32>
    %93 = tpu.matmul %91, %92, %cst_33 {dimension_numbers = #tpu.dot_dimension_numbers<[1], [0], [0], [1], [0, 0, 1, 1], [], []>} : vector<4x4xf32>, vector<4x32xf32>, vector<4x32xf32> -> vector<4x32xf32>
    %94 = vector.extract_strided_slice %44 {offsets = [0, 16], sizes = [4, 4], strides = [1, 1]} : vector<4x64xf32> to vector<4x4xf32>
    %cst_34 = arith.constant dense<0xFF800000> : vector<4xf32>
    %95 = vector.multi_reduction <maximumf>, %94, %cst_34 [1] : vector<4x4xf32> to vector<4xf32>
    %96 = vector.shape_cast %95 : vector<4xf32> to vector<4x1xf32>
    %97 = vector.broadcast %96 : vector<4x1xf32> to vector<4x4xf32>
    %98 = arith.subf %94, %97 : vector<4x4xf32>
    %99 = math.exp %98 : vector<4x4xf32>
    %cst_35 = arith.constant dense<0.000000e+00> : vector<4xf32>
    %100 = vector.multi_reduction <add>, %99, %cst_35 [1] : vector<4x4xf32> to vector<4xf32>
    %101 = vector.shape_cast %100 : vector<4xf32> to vector<4x1xf32>
    %102 = vector.broadcast %101 : vector<4x1xf32> to vector<4x4xf32>
    %103 = arith.divf %99, %102 : vector<4x4xf32>
    %104 = vector.extract_strided_slice %45 {offsets = [16, 0], sizes = [4, 32], strides = [1, 1]} : vector<64x32xf32> to vector<4x32xf32>
    %cst_36 = arith.constant dense<0.000000e+00> : vector<4x32xf32>
    %105 = tpu.matmul %103, %104, %cst_36 {dimension_numbers = #tpu.dot_dimension_numbers<[1], [0], [0], [1], [0, 0, 1, 1], [], []>} : vector<4x4xf32>, vector<4x32xf32>, vector<4x32xf32> -> vector<4x32xf32>
    %106 = vector.extract_strided_slice %44 {offsets = [0, 20], sizes = [4, 4], strides = [1, 1]} : vector<4x64xf32> to vector<4x4xf32>
    %cst_37 = arith.constant dense<0xFF800000> : vector<4xf32>
    %107 = vector.multi_reduction <maximumf>, %106, %cst_37 [1] : vector<4x4xf32> to vector<4xf32>
    %108 = vector.shape_cast %107 : vector<4xf32> to vector<4x1xf32>
    %109 = vector.broadcast %108 : vector<4x1xf32> to vector<4x4xf32>
    %110 = arith.subf %106, %109 : vector<4x4xf32>
    %111 = math.exp %110 : vector<4x4xf32>
    %cst_38 = arith.constant dense<0.000000e+00> : vector<4xf32>
    %112 = vector.multi_reduction <add>, %111, %cst_38 [1] : vector<4x4xf32> to vector<4xf32>
    %113 = vector.shape_cast %112 : vector<4xf32> to vector<4x1xf32>
    %114 = vector.broadcast %113 : vector<4x1xf32> to vector<4x4xf32>
    %115 = arith.divf %111, %114 : vector<4x4xf32>
    %116 = vector.extract_strided_slice %45 {offsets = [20, 0], sizes = [4, 32], strides = [1, 1]} : vector<64x32xf32> to vector<4x32xf32>
    %cst_39 = arith.constant dense<0.000000e+00> : vector<4x32xf32>
    %117 = tpu.matmul %115, %116, %cst_39 {dimension_numbers = #tpu.dot_dimension_numbers<[1], [0], [0], [1], [0, 0, 1, 1], [], []>} : vector<4x4xf32>, vector<4x32xf32>, vector<4x32xf32> -> vector<4x32xf32>
    %118 = vector.extract_strided_slice %44 {offsets = [0, 24], sizes = [4, 4], strides = [1, 1]} : vector<4x64xf32> to vector<4x4xf32>
    %cst_40 = arith.constant dense<0xFF800000> : vector<4xf32>
    %119 = vector.multi_reduction <maximumf>, %118, %cst_40 [1] : vector<4x4xf32> to vector<4xf32>
    %120 = vector.shape_cast %119 : vector<4xf32> to vector<4x1xf32>
    %121 = vector.broadcast %120 : vector<4x1xf32> to vector<4x4xf32>
    %122 = arith.subf %118, %121 : vector<4x4xf32>
    %123 = math.exp %122 : vector<4x4xf32>
    %cst_41 = arith.constant dense<0.000000e+00> : vector<4xf32>
    %124 = vector.multi_reduction <add>, %123, %cst_41 [1] : vector<4x4xf32> to vector<4xf32>
    %125 = vector.shape_cast %124 : vector<4xf32> to vector<4x1xf32>
    %126 = vector.broadcast %125 : vector<4x1xf32> to vector<4x4xf32>
    %127 = arith.divf %123, %126 : vector<4x4xf32>
    %128 = vector.extract_strided_slice %45 {offsets = [24, 0], sizes = [4, 32], strides = [1, 1]} : vector<64x32xf32> to vector<4x32xf32>
    %cst_42 = arith.constant dense<0.000000e+00> : vector<4x32xf32>
    %129 = tpu.matmul %127, %128, %cst_42 {dimension_numbers = #tpu.dot_dimension_numbers<[1], [0], [0], [1], [0, 0, 1, 1], [], []>} : vector<4x4xf32>, vector<4x32xf32>, vector<4x32xf32> -> vector<4x32xf32>
    %130 = vector.extract_strided_slice %44 {offsets = [0, 28], sizes = [4, 4], strides = [1, 1]} : vector<4x64xf32> to vector<4x4xf32>
    %cst_43 = arith.constant dense<0xFF800000> : vector<4xf32>
    %131 = vector.multi_reduction <maximumf>, %130, %cst_43 [1] : vector<4x4xf32> to vector<4xf32>
    %132 = vector.shape_cast %131 : vector<4xf32> to vector<4x1xf32>
    %133 = vector.broadcast %132 : vector<4x1xf32> to vector<4x4xf32>
    %134 = arith.subf %130, %133 : vector<4x4xf32>
    %135 = math.exp %134 : vector<4x4xf32>
    %cst_44 = arith.constant dense<0.000000e+00> : vector<4xf32>
    %136 = vector.multi_reduction <add>, %135, %cst_44 [1] : vector<4x4xf32> to vector<4xf32>
    %137 = vector.shape_cast %136 : vector<4xf32> to vector<4x1xf32>
    %138 = vector.broadcast %137 : vector<4x1xf32> to vector<4x4xf32>
    %139 = arith.divf %135, %138 : vector<4x4xf32>
    %140 = vector.extract_strided_slice %45 {offsets = [28, 0], sizes = [4, 32], strides = [1, 1]} : vector<64x32xf32> to vector<4x32xf32>
    %cst_45 = arith.constant dense<0.000000e+00> : vector<4x32xf32>
    %141 = tpu.matmul %139, %140, %cst_45 {dimension_numbers = #tpu.dot_dimension_numbers<[1], [0], [0], [1], [0, 0, 1, 1], [], []>} : vector<4x4xf32>, vector<4x32xf32>, vector<4x32xf32> -> vector<4x32xf32>
    %142 = vector.extract_strided_slice %44 {offsets = [0, 32], sizes = [4, 4], strides = [1, 1]} : vector<4x64xf32> to vector<4x4xf32>
    %cst_46 = arith.constant dense<0xFF800000> : vector<4xf32>
    %143 = vector.multi_reduction <maximumf>, %142, %cst_46 [1] : vector<4x4xf32> to vector<4xf32>
    %144 = vector.shape_cast %143 : vector<4xf32> to vector<4x1xf32>
    %145 = vector.broadcast %144 : vector<4x1xf32> to vector<4x4xf32>
    %146 = arith.subf %142, %145 : vector<4x4xf32>
    %147 = math.exp %146 : vector<4x4xf32>
    %cst_47 = arith.constant dense<0.000000e+00> : vector<4xf32>
    %148 = vector.multi_reduction <add>, %147, %cst_47 [1] : vector<4x4xf32> to vector<4xf32>
    %149 = vector.shape_cast %148 : vector<4xf32> to vector<4x1xf32>
    %150 = vector.broadcast %149 : vector<4x1xf32> to vector<4x4xf32>
    %151 = arith.divf %147, %150 : vector<4x4xf32>
    %152 = vector.extract_strided_slice %45 {offsets = [32, 0], sizes = [4, 32], strides = [1, 1]} : vector<64x32xf32> to vector<4x32xf32>
    %cst_48 = arith.constant dense<0.000000e+00> : vector<4x32xf32>
    %153 = tpu.matmul %151, %152, %cst_48 {dimension_numbers = #tpu.dot_dimension_numbers<[1], [0], [0], [1], [0, 0, 1, 1], [], []>} : vector<4x4xf32>, vector<4x32xf32>, vector<4x32xf32> -> vector<4x32xf32>
    %154 = vector.extract_strided_slice %44 {offsets = [0, 36], sizes = [4, 4], strides = [1, 1]} : vector<4x64xf32> to vector<4x4xf32>
    %cst_49 = arith.constant dense<0xFF800000> : vector<4xf32>
    %155 = vector.multi_reduction <maximumf>, %154, %cst_49 [1] : vector<4x4xf32> to vector<4xf32>
    %156 = vector.shape_cast %155 : vector<4xf32> to vector<4x1xf32>
    %157 = vector.broadcast %156 : vector<4x1xf32> to vector<4x4xf32>
    %158 = arith.subf %154, %157 : vector<4x4xf32>
    %159 = math.exp %158 : vector<4x4xf32>
    %cst_50 = arith.constant dense<0.000000e+00> : vector<4xf32>
    %160 = vector.multi_reduction <add>, %159, %cst_50 [1] : vector<4x4xf32> to vector<4xf32>
    %161 = vector.shape_cast %160 : vector<4xf32> to vector<4x1xf32>
    %162 = vector.broadcast %161 : vector<4x1xf32> to vector<4x4xf32>
    %163 = arith.divf %159, %162 : vector<4x4xf32>
    %164 = vector.extract_strided_slice %45 {offsets = [36, 0], sizes = [4, 32], strides = [1, 1]} : vector<64x32xf32> to vector<4x32xf32>
    %cst_51 = arith.constant dense<0.000000e+00> : vector<4x32xf32>
    %165 = tpu.matmul %163, %164, %cst_51 {dimension_numbers = #tpu.dot_dimension_numbers<[1], [0], [0], [1], [0, 0, 1, 1], [], []>} : vector<4x4xf32>, vector<4x32xf32>, vector<4x32xf32> -> vector<4x32xf32>
    %166 = vector.extract_strided_slice %44 {offsets = [0, 40], sizes = [4, 4], strides = [1, 1]} : vector<4x64xf32> to vector<4x4xf32>
    %cst_52 = arith.constant dense<0xFF800000> : vector<4xf32>
    %167 = vector.multi_reduction <maximumf>, %166, %cst_52 [1] : vector<4x4xf32> to vector<4xf32>
    %168 = vector.shape_cast %167 : vector<4xf32> to vector<4x1xf32>
    %169 = vector.broadcast %168 : vector<4x1xf32> to vector<4x4xf32>
    %170 = arith.subf %166, %169 : vector<4x4xf32>
    %171 = math.exp %170 : vector<4x4xf32>
    %cst_53 = arith.constant dense<0.000000e+00> : vector<4xf32>
    %172 = vector.multi_reduction <add>, %171, %cst_53 [1] : vector<4x4xf32> to vector<4xf32>
    %173 = vector.shape_cast %172 : vector<4xf32> to vector<4x1xf32>
    %174 = vector.broadcast %173 : vector<4x1xf32> to vector<4x4xf32>
    %175 = arith.divf %171, %174 : vector<4x4xf32>
    %176 = vector.extract_strided_slice %45 {offsets = [40, 0], sizes = [4, 32], strides = [1, 1]} : vector<64x32xf32> to vector<4x32xf32>
    %cst_54 = arith.constant dense<0.000000e+00> : vector<4x32xf32>
    %177 = tpu.matmul %175, %176, %cst_54 {dimension_numbers = #tpu.dot_dimension_numbers<[1], [0], [0], [1], [0, 0, 1, 1], [], []>} : vector<4x4xf32>, vector<4x32xf32>, vector<4x32xf32> -> vector<4x32xf32>
    %178 = vector.extract_strided_slice %44 {offsets = [0, 44], sizes = [4, 4], strides = [1, 1]} : vector<4x64xf32> to vector<4x4xf32>
    %cst_55 = arith.constant dense<0xFF800000> : vector<4xf32>
    %179 = vector.multi_reduction <maximumf>, %178, %cst_55 [1] : vector<4x4xf32> to vector<4xf32>
    %180 = vector.shape_cast %179 : vector<4xf32> to vector<4x1xf32>
    %181 = vector.broadcast %180 : vector<4x1xf32> to vector<4x4xf32>
    %182 = arith.subf %178, %181 : vector<4x4xf32>
    %183 = math.exp %182 : vector<4x4xf32>
    %cst_56 = arith.constant dense<0.000000e+00> : vector<4xf32>
    %184 = vector.multi_reduction <add>, %183, %cst_56 [1] : vector<4x4xf32> to vector<4xf32>
    %185 = vector.shape_cast %184 : vector<4xf32> to vector<4x1xf32>
    %186 = vector.broadcast %185 : vector<4x1xf32> to vector<4x4xf32>
    %187 = arith.divf %183, %186 : vector<4x4xf32>
    %188 = vector.extract_strided_slice %45 {offsets = [44, 0], sizes = [4, 32], strides = [1, 1]} : vector<64x32xf32> to vector<4x32xf32>
    %cst_57 = arith.constant dense<0.000000e+00> : vector<4x32xf32>
    %189 = tpu.matmul %187, %188, %cst_57 {dimension_numbers = #tpu.dot_dimension_numbers<[1], [0], [0], [1], [0, 0, 1, 1], [], []>} : vector<4x4xf32>, vector<4x32xf32>, vector<4x32xf32> -> vector<4x32xf32>
    %190 = vector.extract_strided_slice %44 {offsets = [0, 48], sizes = [4, 4], strides = [1, 1]} : vector<4x64xf32> to vector<4x4xf32>
    %cst_58 = arith.constant dense<0xFF800000> : vector<4xf32>
    %191 = vector.multi_reduction <maximumf>, %190, %cst_58 [1] : vector<4x4xf32> to vector<4xf32>
    %192 = vector.shape_cast %191 : vector<4xf32> to vector<4x1xf32>
    %193 = vector.broadcast %192 : vector<4x1xf32> to vector<4x4xf32>
    %194 = arith.subf %190, %193 : vector<4x4xf32>
    %195 = math.exp %194 : vector<4x4xf32>
    %cst_59 = arith.constant dense<0.000000e+00> : vector<4xf32>
    %196 = vector.multi_reduction <add>, %195, %cst_59 [1] : vector<4x4xf32> to vector<4xf32>
    %197 = vector.shape_cast %196 : vector<4xf32> to vector<4x1xf32>
    %198 = vector.broadcast %197 : vector<4x1xf32> to vector<4x4xf32>
    %199 = arith.divf %195, %198 : vector<4x4xf32>
    %200 = vector.extract_strided_slice %45 {offsets = [48, 0], sizes = [4, 32], strides = [1, 1]} : vector<64x32xf32> to vector<4x32xf32>
    %cst_60 = arith.constant dense<0.000000e+00> : vector<4x32xf32>
    %201 = tpu.matmul %199, %200, %cst_60 {dimension_numbers = #tpu.dot_dimension_numbers<[1], [0], [0], [1], [0, 0, 1, 1], [], []>} : vector<4x4xf32>, vector<4x32xf32>, vector<4x32xf32> -> vector<4x32xf32>
    %202 = vector.extract_strided_slice %44 {offsets = [0, 52], sizes = [4, 4], strides = [1, 1]} : vector<4x64xf32> to vector<4x4xf32>
    %cst_61 = arith.constant dense<0xFF800000> : vector<4xf32>
    %203 = vector.multi_reduction <maximumf>, %202, %cst_61 [1] : vector<4x4xf32> to vector<4xf32>
    %204 = vector.shape_cast %203 : vector<4xf32> to vector<4x1xf32>
    %205 = vector.broadcast %204 : vector<4x1xf32> to vector<4x4xf32>
    %206 = arith.subf %202, %205 : vector<4x4xf32>
    %207 = math.exp %206 : vector<4x4xf32>
    %cst_62 = arith.constant dense<0.000000e+00> : vector<4xf32>
    %208 = vector.multi_reduction <add>, %207, %cst_62 [1] : vector<4x4xf32> to vector<4xf32>
    %209 = vector.shape_cast %208 : vector<4xf32> to vector<4x1xf32>
    %210 = vector.broadcast %209 : vector<4x1xf32> to vector<4x4xf32>
    %211 = arith.divf %207, %210 : vector<4x4xf32>
    %212 = vector.extract_strided_slice %45 {offsets = [52, 0], sizes = [4, 32], strides = [1, 1]} : vector<64x32xf32> to vector<4x32xf32>
    %cst_63 = arith.constant dense<0.000000e+00> : vector<4x32xf32>
    %213 = tpu.matmul %211, %212, %cst_63 {dimension_numbers = #tpu.dot_dimension_numbers<[1], [0], [0], [1], [0, 0, 1, 1], [], []>} : vector<4x4xf32>, vector<4x32xf32>, vector<4x32xf32> -> vector<4x32xf32>
    %214 = vector.extract_strided_slice %44 {offsets = [0, 56], sizes = [4, 4], strides = [1, 1]} : vector<4x64xf32> to vector<4x4xf32>
    %cst_64 = arith.constant dense<0xFF800000> : vector<4xf32>
    %215 = vector.multi_reduction <maximumf>, %214, %cst_64 [1] : vector<4x4xf32> to vector<4xf32>
    %216 = vector.shape_cast %215 : vector<4xf32> to vector<4x1xf32>
    %217 = vector.broadcast %216 : vector<4x1xf32> to vector<4x4xf32>
    %218 = arith.subf %214, %217 : vector<4x4xf32>
    %219 = math.exp %218 : vector<4x4xf32>
    %cst_65 = arith.constant dense<0.000000e+00> : vector<4xf32>
    %220 = vector.multi_reduction <add>, %219, %cst_65 [1] : vector<4x4xf32> to vector<4xf32>
    %221 = vector.shape_cast %220 : vector<4xf32> to vector<4x1xf32>
    %222 = vector.broadcast %221 : vector<4x1xf32> to vector<4x4xf32>
    %223 = arith.divf %219, %222 : vector<4x4xf32>
    %224 = vector.extract_strided_slice %45 {offsets = [56, 0], sizes = [4, 32], strides = [1, 1]} : vector<64x32xf32> to vector<4x32xf32>
    %cst_66 = arith.constant dense<0.000000e+00> : vector<4x32xf32>
    %225 = tpu.matmul %223, %224, %cst_66 {dimension_numbers = #tpu.dot_dimension_numbers<[1], [0], [0], [1], [0, 0, 1, 1], [], []>} : vector<4x4xf32>, vector<4x32xf32>, vector<4x32xf32> -> vector<4x32xf32>
    %226 = vector.extract_strided_slice %44 {offsets = [0, 60], sizes = [4, 4], strides = [1, 1]} : vector<4x64xf32> to vector<4x4xf32>
    %cst_67 = arith.constant dense<0xFF800000> : vector<4xf32>
    %227 = vector.multi_reduction <maximumf>, %226, %cst_67 [1] : vector<4x4xf32> to vector<4xf32>
    %228 = vector.shape_cast %227 : vector<4xf32> to vector<4x1xf32>
    %229 = vector.broadcast %228 : vector<4x1xf32> to vector<4x4xf32>
    %230 = arith.subf %226, %229 : vector<4x4xf32>
    %231 = math.exp %230 : vector<4x4xf32>
    %cst_68 = arith.constant dense<0.000000e+00> : vector<4xf32>
    %232 = vector.multi_reduction <add>, %231, %cst_68 [1] : vector<4x4xf32> to vector<4xf32>
    %233 = vector.shape_cast %232 : vector<4xf32> to vector<4x1xf32>
    %234 = vector.broadcast %233 : vector<4x1xf32> to vector<4x4xf32>
    %235 = arith.divf %231, %234 : vector<4x4xf32>
    %236 = vector.extract_strided_slice %45 {offsets = [60, 0], sizes = [4, 32], strides = [1, 1]} : vector<64x32xf32> to vector<4x32xf32>
    %cst_69 = arith.constant dense<0.000000e+00> : vector<4x32xf32>
    %237 = tpu.matmul %235, %236, %cst_69 {dimension_numbers = #tpu.dot_dimension_numbers<[1], [0], [0], [1], [0, 0, 1, 1], [], []>} : vector<4x4xf32>, vector<4x32xf32>, vector<4x32xf32> -> vector<4x32xf32>
    %238 = tpu.concatenate %57, %69, %81, %93, %105, %117, %129, %141, %153, %165, %177, %189, %201, %213, %225, %237 in 1 : vector<4x32xf32>, vector<4x32xf32>, vector<4x32xf32>, vector<4x32xf32>, vector<4x32xf32>, vector<4x32xf32>, vector<4x32xf32>, vector<4x32xf32>, vector<4x32xf32>, vector<4x32xf32>, vector<4x32xf32>, vector<4x32xf32>, vector<4x32xf32>, vector<4x32xf32>, vector<4x32xf32>, vector<4x32xf32> -> vector<4x512xf32>
    %c0_70 = arith.constant 0 : index
    %c0_71 = arith.constant 0 : index
    %239 = vector.load %arg8[%c0_70, %c0_71] : memref<4x512xf32, #tpu.memory_space<vmem>>, vector<4x512xf32>
    tpu.vector_store %arg8[%c0_70, %c0_71], %238 {strides = array<i32>} : memref<4x512xf32, #tpu.memory_space<vmem>>, vector<4x512xf32>,
    return
  }
  func.func @transform_0(%arg0: i32) -> (i32, i32) {
    %c0_i32 = arith.constant 0 : i32
    %c0_i32_0 = arith.constant 0 : i32
    %c0_i32_1 = arith.constant 0 : i32
    return %c0_i32, %c0_i32_0 : i32, i32
  }
  func.func @transform_1(%arg0: i32) -> (i32, i32) {
    %c0_i32 = arith.constant 0 : i32
    %c0_i32_0 = arith.constant 0 : i32
    %c0_i32_1 = arith.constant 0 : i32
    return %c0_i32, %c0_i32_0 : i32, i32
  }
  func.func @transform_2(%arg0: i32) -> (i32, i32) {
    %c0_i32 = arith.constant 0 : i32
    %c0_i32_0 = arith.constant 0 : i32
    %c0_i32_1 = arith.constant 0 : i32
    return %c0_i32, %c0_i32_0 : i32, i32
  }
  func.func @transform_3(%arg0: i32) -> (i32, i32) {
    %c0_i32 = arith.constant 0 : i32
    %c0_i32_0 = arith.constant 0 : i32
    %c0_i32_1 = arith.constant 0 : i32
    return %c0_i32, %c0_i32_0 : i32, i32
  }
  func.func @transform_4(%arg0: i32) -> (i32, i32) {
    %c0_i32 = arith.constant 0 : i32
    %c0_i32_0 = arith.constant 0 : i32
    %c0_i32_1 = arith.constant 0 : i32
    return %c0_i32, %c0_i32_0 : i32, i32
  }
  func.func @transform_5(%arg0: i32) -> (i32, i32) {
    %c0_i32 = arith.constant 0 : i32
    %c0_i32_0 = arith.constant 0 : i32
    %c0_i32_1 = arith.constant 0 : i32
    return %c0_i32, %c0_i32_0 : i32, i32
  }
  func.func @transform_6(%arg0: i32) -> (i32, i32) {
    %c0_i32 = arith.constant 0 : i32
    %c0_i32_0 = arith.constant 0 : i32
    %c0_i32_1 = arith.constant 0 : i32
    return %c0_i32, %c0_i32_0 : i32, i32
  }
  func.func @transform_7(%arg0: i32) -> (i32, i32) {
    %c0_i32 = arith.constant 0 : i32
    %c0_i32_0 = arith.constant 0 : i32
    %c0_i32_1 = arith.constant 0 : i32
    return %c0_i32, %c0_i32_0 : i32, i32
  }
}

</mosaic_0001>

<bundles_post_ra>
// kernel: tpu_custom_call.1
= control target key start
LH: loop header
LB: loop body
LE: loop exit
PB: predicated region body
PF: predicated region fallthrough
CT: control target
= control target key end

     0   :  { %vm31_vm0 = vcmask 130048   ;;  %s1809_s0 = inlined_call_operand.vmem [shape: f32[4,16], index: 0, kind: input, shape index: {}]   ;;  %s1810_s1 = inlined_call_operand.vmem [shape: f32[16,16], index: 1, kind: input, shape index: {}]   ;;  %s1811_s2 = inlined_call_operand.vmem [shape: f32[16,16], index: 2, kind: input, shape index: {}]   ;;  %s1812_s3 = inlined_call_operand.vmem [shape: f32[16,8], index: 3, kind: input, shape index: {}]   ;;  %s1813_s4 = inlined_call_operand.vmem [shape: f32[6,16], index: 4, kind: input, shape index: {}]   ;;  %s1814_s5 = inlined_call_operand.vmem [shape: f32[8,64], index: 5, kind: input, shape index: {}]   ;;  %s1815_s6 = inlined_call_operand.vmem [shape: f32[64,32], index: 6, kind: input, shape index: {}]   ;;  %s1816_s7 = inlined_call_operand.hbm [shape: f32[4,512], index: 7, kind: output, shape index: {}]  }
   0x1   :  { %v29_v0 = vld [vmem:[%s1810_s1 + $0x8] sm:$0xff]  ;;  %v28_v1 = vld [vmem:[%s1810_s1] sm:$0xff] }
   0x2   :  { %49 = vmatpush.msra.mxu0 %v29_v0  ;;  %v27_v2 = vld [vmem:[%s1809_s0] sm:$0xf]  ;;  %74 = vmatpush.msra.mxu1 %v29_v0 }
   0x3   :  { %12 = vsyncpa [#allocation3], 0  ;;  %139 = vmatpush.msra.mxu3 %v29_v0  ;;  %v96_v6 = vld [vmem:[%s1811_s2 + $0x8] sm:$0xff]  ;;  %v95_v7 = vld [vmem:[%s1811_s2] sm:$0xff]  ;;  %vm212_vm7 = vcmask 64512   ;;  %vm810_vm8 = vcmask 355648  }
   0x4   :  { %50 = vmatpush.msra.mxu0 %v28_v1  ;;  %75 = vmatpush.msra.mxu1 %v28_v1  ;;  %v30_v15 = vld [vmem:[%s1813_s4] sm:$0x3f]  ;;  %v186_v30 = vld [vmem:[%s1812_s3 + $0x8] sm:$0xff]  ;;  %vm297_vm9 = vcmask 60448   ;;  %vm244_vm10 = vcmask 27648   ;;  %vm924_vm11 = vcmask 421248  }
   0x5   :  { %1243 = vmatmul.msk.f32.vlgmr.msra.gmra.mxu0 %vm31_vm0, %v27_v2  ;;  %140 = vmatpush.msra.mxu3 %v28_v1  ;;  %v91_v17 = vperm.slane %v30_v15, 0  ;;  %v93_v20 = vperm.slane %v30_v15, 1  ;;  %v97_v23 = vperm.slane %v30_v15, 2  ;;  %v185_v31 = vld [vmem:[%s1812_s3] sm:$0xff]  ;;  %v181_v41 = vperm.slane %v30_v15, 3  ;;  %s1394_s3 = smov 124  }
   0x6   :  { %164 = vmatpush.msrb.mxu0 %v29_v0  ;;  %115 = vmatpush.msra.mxu2 %v96_v6  ;;  %v211_v32 = vld [vmem:[%s1814_s5] sm:$0xff]  ;;  %v183_v44 = vperm.slane %v30_v15, 4  ;;  %v187_v47 = vperm.slane %v30_v15, 5  ;;  %vm411_vm12 = vcmask 126048   ;;  %vm354_vm13 = vcmask 93248   ;;  %s1395_s5 = smov 120  }
   0x7   :  { %205 = vmatpush.msrb.mxu1 %v186_v30  ;;  %vm468_vm14 = vcmask 158848   ;;  %vm525_vm15 = vcmask 191648   ;;  %s1396_s15 = smov 112   ;;  %s1397_s16 = smov 108  }
   0x8   :  { %165 = vmatpush.msrb.mxu0 %v28_v1  ;;  %116 = vmatpush.msra.mxu2 %v95_v7  ;;  %s1398_s17 = smov 116   ;;  %s1399_s18 = smov 100  }
   0x9   :  { %206 = vmatpush.msrb.mxu1 %v185_v31  ;;  %s1400_s19 = smov 104   ;;  %s1401_s20 = smov 92  }
   0xa   :  { %231 = vmatpush.msrb.mxu2 %v211_v32  ;;  %s1402_s21 = smov 84   ;;  %s1403_s22 = smov 80  }
   0xb   :  { %s1404_s23 = smov 68   ;;  %s1405_s24 = smov 72  }
   0xc   :  { %s1406_s25 = smov 96   ;;  %s1407_s26 = smov 88  }
   0xd   :  { %s1408_s27 = smov 76  }
  0x82   :  { %v52_v3 = vpop.f32.mrf.mxu0 }
  0x83   :  { %v55_v4 = vsub.f32 %v27_v2, %v52_v3 }
  0x85   :  { %v56_v5 = vmul.f32 %v55_v4, %v55_v4 }
  0x87   :  { %1244 = vmatmul.msk.f32.vlgmr.msra.gmra.mxu1 %vm31_vm0, %v56_v5 }
 0x104   :  { %v77_v8 = vpop.f32.mrf.mxu1 }
 0x105   :  { %v78_v9 = vadd.f32 1e-05, %v77_v8 }
 0x107   :  { %1300 = vrsqrt.f32 %v78_v9  ;;  %vm86_vm2 = vweird.f32 %v78_v9 }
 0x10d   :  { %v1301_v10 = vpop.eup %1300 }
 0x10e   :  { %v81_v11 = vmul.f32 %v1301_v10, %v78_v9  ;;  %vm87_vm1 = vweird.f32 %v1301_v10 }
 0x10f   :  { %vm88_vm3 = vmor %vm86_vm2, %vm87_vm1  ;;  %vm639_vm1 = vcmask 257248   ;;  %vm867_vm2 = vcmask 388448  }
 0x110   :  { %v82_v12 = vmul.f32 %v1301_v10, %v81_v11 }
 0x112   :  { %v83_v13 = vmul.f32 0.5, %v82_v12 }
 0x114   :  { %v84_v14 = vsub.f32 1.5, %v83_v13 }
 0x116   :  { %v85_v16 = vmul.f32 %v1301_v10, %v84_v14 }
 0x118   :  { %v89_v18 = vsel %vm88_vm3, %v1301_v10, %v85_v16  ;;  %vm753_vm3 = vcmask 322848  }
 0x119   :  { %v90_v19 = vmul.f32 %v89_v18, %v55_v4 }
 0x11b   :  { %v92_v21 = vmul.f32 %v91_v17, %v90_v19 }
 0x11d   :  { %v94_v22 = vadd.f32 %v93_v20, %v92_v21 }
 0x11f   :  { %1245 = vmatmul.msk.f32.vlgmr.msra.gmra.mxu2 %vm31_vm0, %v94_v22 }
 0x1a2   :  { %v118_v24 = vpop.f32.mrf.mxu2 }
 0x1a3   :  { %v119_v25 = vadd.f32 %v118_v24, %v97_v23 }
 0x1a5   :  { %v121_v26 = vmax.f32 %v119_v25, 0.0 }
 0x1a7   :  { %1246 = vmatmul.msk.f32.vlgmr.msra.gmra.mxu3 %vm31_vm0, %v121_v26 }
 0x22a   :  { %v142_v27 = vpop.f32.mrf.mxu3 }
 0x22b   :  { %v145_v28 = vsub.f32 %v121_v26, %v142_v27 }
 0x22d   :  { %v146_v29 = vmul.f32 %v145_v28, %v145_v28 }
 0x22f   :  { %1247 = vmatmul.msk.f32.vlgmr.msrb.gmra.mxu0 %vm31_vm0, %v146_v29 }
 0x2ac   :  { %v167_v33 = vpop.f32.mrf.mxu0 }
 0x2ad   :  { %v168_v34 = vadd.f32 1e-05, %v167_v33 }
 0x2af   :  { %1302 = vrsqrt.f32 %v168_v34  ;;  %vm176_vm5 = vweird.f32 %v168_v34 }
 0x2b5   :  { %v1303_v35 = vpop.eup %1302 }
 0x2b6   :  { %v171_v36 = vmul.f32 %v1303_v35, %v168_v34  ;;  %vm177_vm4 = vweird.f32 %v1303_v35 }
 0x2b7   :  { %vm178_vm6 = vmor %vm176_vm5, %vm177_vm4  ;;  %vm1095_vm4 = vcmask 519648   ;;  %vm981_vm5 = vcmask 454048  }
 0x2b8   :  { %v172_v37 = vmul.f32 %v1303_v35, %v171_v36 }
 0x2ba   :  { %v173_v38 = vmul.f32 0.5, %v172_v37 }
 0x2bc   :  { %v174_v39 = vsub.f32 1.5, %v173_v38 }
 0x2be   :  { %v175_v40 = vmul.f32 %v1303_v35, %v174_v39 }
 0x2c0   :  { %v179_v42 = vsel %vm178_vm6, %v1303_v35, %v175_v40  ;;  %vm1038_vm6 = vcmask 486848  }
 0x2c1   :  { %v180_v43 = vmul.f32 %v179_v42, %v145_v28 }
 0x2c3   :  { %v182_v45 = vmul.f32 %v181_v41, %v180_v43 }
 0x2c5   :  { %v184_v46 = vadd.f32 %v183_v44, %v182_v45 }
 0x2c7   :  { %1248 = vmatmul.msk.f32.vlgmr.msrb.gmra.mxu1 %vm31_vm0, %v184_v46  ;;  %vm582_vm0 = vcmask 224448  }
 0x344   :  { %v208_v48 = vpop.f32.mrf.mxu1 }
 0x345   :  { %v209_v49 = vadd.f32 %v208_v48, %v187_v47 }
 0x347   :  { %1249 = vmatmul.msk.f32.vlgmr.msrb.gmra.mxu2 %vm212_vm7, %v209_v49  ;;  %vm696_vm7 = vcmask 290048  }
 0x3ca   :  { %v1485_v50 = vpop.f32.mrf.mxu2 }
 0x3cb   :  { %v811_v51 = vsel %vm810_vm8, %v1485_v50, -inf  ;;  %v298_v52 = vsel %vm297_vm9, %v1485_v50, -inf  ;;  %v245_v53 = vsel %vm244_vm10, %v1485_v50, -inf  ;;  %v925_v54 = vsel %vm924_vm11, %v1485_v50, -inf }
 0x3cc   :  { %812 = vmax.xlane.f32.xlu2 %v811_v51  ;;  %299 = vmax.xlane.f32.xlu1 %v298_v52  ;;  %v412_v55 = vsel %vm411_vm12, %v1485_v50, -inf  ;;  %v355_v56 = vsel %vm354_vm13, %v1485_v50, -inf  ;;  %v469_v57 = vsel %vm468_vm14, %v1485_v50, -inf  ;;  %v526_v58 = vsel %vm525_vm15, %v1485_v50, -inf }
 0x3cd   :  { %246 = vmax.xlane.f32.xlu0 %v245_v53  ;;  %v583_v59 = vsel %vm582_vm0, %v1485_v50, -inf  ;;  %v640_v60 = vsel %vm639_vm1, %v1485_v50, -inf  ;;  %v868_v61 = vsel %vm867_vm2, %v1485_v50, -inf  ;;  %v754_v62 = vsel %vm753_vm3, %v1485_v50, -inf }
 0x3ce   :  { %v1096_v63 = vsel %vm1095_vm4, %v1485_v50, -inf  ;;  %v982_v0 = vsel %vm981_vm5, %v1485_v50, -inf  ;;  %v1039_v1 = vsel %vm1038_vm6, %v1485_v50, -inf  ;;  %v697_v2 = vsel %vm696_vm7, %v1485_v50, -inf }
 0x3cf   :  { %vm273_vm8 = vcmask 1043456   ;;  %vm269_vm14 = vcmask 31744  }
 0x3d4   :  { %926 = vmax.xlane.f32.xlu2 %v925_v54  ;;  %413 = vmax.xlane.f32.xlu1 %v412_v55 }
 0x3d5   :  { %356 = vmax.xlane.f32.xlu0 %v355_v56 }
 0x3dc   :  { %470 = vmax.xlane.f32.xlu1 %v469_v57 }
 0x3dd   :  { %527 = vmax.xlane.f32.xlu0 %v526_v58 }
 0x3e4   :  { %584 = vmax.xlane.f32.xlu1 %v583_v59 }
 0x3e5   :  { %641 = vmax.xlane.f32.xlu0 %v640_v60 }
 0x3ec   :  { %869 = vmax.xlane.f32.xlu1 %v868_v61 }
 0x3ed   :  { %755 = vmax.xlane.f32.xlu0 %v754_v62 }
 0x3f5   :  { %1097 = vmax.xlane.f32.xlu0 %v1096_v63 }
 0x3fd   :  { %983 = vmax.xlane.f32.xlu0 %v982_v0 }
 0x405   :  { %1040 = vmax.xlane.f32.xlu0 %v1039_v1 }
 0x40d   :  { %698 = vmax.xlane.f32.xlu0 %v697_v2 }
 0x43f   :  { %v300_v3 = vpop.xlane.xlu1 %299  ;;  %v1519_v21 = vpop.xlane.xlu2 %812 }
 0x440   :  { %v301_v4 = vsub.f32 %v1485_v50, %v300_v3  ;;  %v1505_v5 = vpop.xlane.xlu0 %246  ;;  %v814_v58 = vsub.f32 %v1485_v50, %v1519_v21 }
 0x441   :  { %v248_v1 = vsub.f32 %v1485_v50, %v1505_v5 }
 0x442   :  { %v302_v6 = vmul.f32 1.442695, %v301_v4  ;;  %v815_v59 = vmul.f32 1.442695, %v814_v58 }
 0x443   :  { %v249_v2 = vmul.f32 1.442695, %v248_v1 }
 0x444   :  { %1304 = vpow2.f32 %v302_v6 }
 0x447   :  { %v414_v7 = vpop.xlane.xlu1 %413  ;;  %v927_v34 = vpop.xlane.xlu2 %926 }
 0x448   :  { %v357_v8 = vpop.xlane.xlu0 %356  ;;  %v415_v12 = vsub.f32 %v1485_v50, %v414_v7  ;;  %v928_v40 = vsub.f32 %v1485_v50, %v927_v34 }
 0x449   :  { %v358_v9 = vsub.f32 %v1485_v50, %v357_v8 }
 0x44a   :  { %v1508_v10 = vpop.eup %1304  ;;  %v416_v17 = vmul.f32 1.442695, %v415_v12  ;;  %v929_v41 = vmul.f32 1.442695, %v928_v40 }
 0x44b   :  { %v359_v11 = vmul.f32 1.442695, %v358_v9  ;;  %305 = vrot.lane.b32.xlu1 %v1508_v10, %s1394_s3 }
 0x44d   :  { %1306 = vpow2.f32 %v359_v11 }
 0x44f   :  { %v471_v13 = vpop.xlane.xlu1 %470 }
 0x450   :  { %v472_v14 = vsub.f32 %v1485_v50, %v471_v13  ;;  %v528_v15 = vpop.xlane.xlu0 %527 }
 0x451   :  { %v529_v16 = vsub.f32 %v1485_v50, %v528_v15 }
 0x452   :  { %v473_v18 = vmul.f32 1.442695, %v472_v14 }
 0x453   :  { %v530_v19 = vmul.f32 1.442695, %v529_v16  ;;  %v1515_v20 = vpop.eup %1306 }
 0x454   :  { %1308 = vpow2.f32 %v473_v18  ;;  %362 = vrot.lane.b32.xlu0 %v1515_v20, %s1395_s5 }
 0x455   :  { %1310 = vpow2.f32 %v530_v19 }
 0x456   :  { %1312 = vpow2.f32 %v416_v17 }
 0x457   :  { %v585_v22 = vpop.xlane.xlu1 %584 }
 0x458   :  { %v586_v23 = vsub.f32 %v1485_v50, %v585_v22  ;;  %v642_v24 = vpop.xlane.xlu0 %641 }
 0x459   :  { %v643_v25 = vsub.f32 %v1485_v50, %v642_v24 }
 0x45a   :  { %v1523_v26 = vpop.eup %1308  ;;  %v587_v27 = vmul.f32 1.442695, %v586_v23 }
 0x45b   :  { %v1525_v28 = vpop.eup %1310  ;;  %v644_v29 = vmul.f32 1.442695, %v643_v25  ;;  %476 = vrot.lane.b32.xlu1 %v1523_v26, %s1396_s15 }
 0x45c   :  { %v1529_v30 = vpop.eup %1312  ;;  %1314 = vpow2.f32 %v587_v27  ;;  %533 = vrot.lane.b32.xlu2 %v1525_v28, %s1397_s16 }
 0x45d   :  { %1316 = vpow2.f32 %v644_v29  ;;  %419 = vrot.lane.b32.xlu0 %v1529_v30, %s1398_s17 }
 0x45f   :  { %v870_v31 = vpop.xlane.xlu1 %869 }
 0x460   :  { %v871_v32 = vsub.f32 %v1485_v50, %v870_v31  ;;  %v756_v33 = vpop.xlane.xlu0 %755 }
 0x461   :  { %v757_v35 = vsub.f32 %v1485_v50, %v756_v33 }
 0x462   :  { %v1537_v36 = vpop.eup %1314  ;;  %v872_v37 = vmul.f32 1.442695, %v871_v32 }
 0x463   :  { %v1539_v38 = vpop.eup %1316  ;;  %v758_v39 = vmul.f32 1.442695, %v757_v35 }
 0x464   :  { %1318 = vpow2.f32 %v872_v37  ;;  %647 = vrot.lane.b32.xlu1 %v1539_v38, %s1399_s18  ;;  %v236_v37 = vld [vmem:[%s1815_s6] sm:$0xff] }
 0x465   :  { %1320 = vpow2.f32 %v758_v39  ;;  %590 = vrot.lane.b32.xlu0 %v1537_v36, %s1400_s19  ;;  %1250 = vmatpush.msk.msrb.mxu3 %vm273_vm8, %v236_v37  ;;  %v329_v40 = vrot.slane %v236_v37, 4 }
 0x466   :  { %1322 = vpow2.f32 %v929_v41 }
 0x467   :  { %1252 = vmatpush.msk.msra.mxu0 %vm273_vm8, %v329_v40 }
 0x468   :  { %v1098_v42 = vpop.xlane.xlu0 %1097 }
 0x469   :  { %v1099_v43 = vsub.f32 %v1485_v50, %v1098_v42 }
 0x46a   :  { %v1547_v44 = vpop.eup %1318 }
 0x46b   :  { %v1549_v45 = vpop.eup %1320  ;;  %v1100_v46 = vmul.f32 1.442695, %v1099_v43 }
 0x46c   :  { %761 = vrot.lane.b32.xlu2 %v1549_v45, %s1401_s20  ;;  %v1555_v48 = vpop.eup %1322 }
 0x46d   :  { %1324 = vpow2.f32 %v1100_v46  ;;  %875 = vrot.lane.b32.xlu0 %v1547_v44, %s1402_s21 }
 0x470   :  { %v984_v47 = vpop.xlane.xlu0 %983 }
 0x471   :  { %v985_v61 = vsub.f32 %v1485_v50, %v984_v47 }
 0x473   :  { %v1557_v49 = vpop.eup %1324  ;;  %v986_v62 = vmul.f32 1.442695, %v985_v61 }
 0x474   :  { %932 = vrot.lane.b32.xlu2 %v1555_v48, %s1403_s22 }
 0x475   :  { %1103 = vrot.lane.b32.xlu0 %v1557_v49, %s1404_s23 }
 0x478   :  { %v1041_v51 = vpop.xlane.xlu0 %1040 }
 0x479   :  { %v1042_v52 = vsub.f32 %v1485_v50, %v1041_v51 }
 0x47b   :  { %v1043_v53 = vmul.f32 1.442695, %v1042_v52 }
 0x47d   :  { %1326 = vpow2.f32 %v1043_v53 }
 0x480   :  { %v699_v54 = vpop.xlane.xlu0 %698 }
 0x481   :  { %v700_v55 = vsub.f32 %v1485_v50, %v699_v54 }
 0x483   :  { %v1565_v56 = vpop.eup %1326  ;;  %v701_v57 = vmul.f32 1.442695, %v700_v55 }
 0x484   :  { %1046 = vrot.lane.b32.xlu0 %v1565_v56, %s1405_s24 }
 0x485   :  { %1328 = vpow2.f32 %v701_v57 }
 0x486   :  { %1330 = vpow2.f32 %v815_v59 }
 0x487   :  { %1332 = vpow2.f32 %v986_v62 }
 0x488   :  { %1334 = vpow2.f32 %v249_v2 }
 0x48b   :  { %v1571_v60 = vpop.eup %1328 }
 0x48c   :  { %704 = vrot.lane.b32.xlu1 %v1571_v60, %s1406_s25  ;;  %v1576_v63 = vpop.eup %1330 }
 0x48d   :  { %v1580_v0 = vpop.eup %1332 }
 0x48e   :  { %v1586_v3 = vpop.eup %1334 }
 0x48f   :  { %v251_v4 = vsel %vm244_vm10, %v1586_v3, 0.0 }
 0x494   :  { %818 = vrot.lane.b32.xlu1 %v1576_v63, %s1407_s26 }
 0x49c   :  { %989 = vrot.lane.b32.xlu1 %v1580_v0, %s1408_s27 }
 0x4ae   :  { %252 = vadd.xlane.f32.xlu0 %v251_v4 }
 0x4b6   :  { %v534_v15 = vpop.permute.xlu2 %533 }
 0x4b7   :  { %v536_v17 = vsel %vm244_vm10, %v534_v15, 0.0 }
 0x4bd   :  { %v306_v6 = vpop.permute.xlu1 %305 }
 0x4be   :  { %v308_v7 = vsel %vm244_vm10, %v306_v6, 0.0 }
 0x4bf   :  { %309 = vadd.xlane.f32.xlu2 %v308_v7 }
 0x4c6   :  { %v363_v8 = vpop.permute.xlu0 %362  ;;  %v762_v19 = vpop.permute.xlu2 %761 }
 0x4c7   :  { %v365_v9 = vsel %vm244_vm10, %v363_v8, 0.0  ;;  %v764_v21 = vsel %vm244_vm10, %v762_v19, 0.0 }
 0x4c8   :  { %366 = vadd.xlane.f32.xlu2 %v365_v9 }
 0x4cd   :  { %v477_v11 = vpop.permute.xlu1 %476 }
 0x4ce   :  { %v479_v13 = vsel %vm244_vm10, %v477_v11, 0.0  ;;  %v1609_v46 = vpop.permute.xlu2 %932 }
 0x4cf   :  { %v420_v50 = vpop.permute.xlu0 %419 }
 0x4d0   :  { %v422_v5 = vsel %vm244_vm10, %v420_v50, 0.0 }
 0x4d1   :  { %423 = vadd.xlane.f32.xlu0 %v422_v5 }
 0x4d6   :  { %v648_v16 = vpop.permute.xlu1 %647 }
 0x4d7   :  { %v591_v12 = vpop.permute.xlu0 %590  ;;  %v650_v18 = vsel %vm244_vm10, %v648_v16, 0.0 }
 0x4d8   :  { %v593_v14 = vsel %vm244_vm10, %v591_v12, 0.0 }
 0x4d9   :  { %480 = vadd.xlane.f32.xlu0 %v479_v13  ;;  %594 = vadd.xlane.f32.xlu2 %v593_v14 }
 0x4df   :  { %v876_v24 = vpop.permute.xlu0 %875 }
 0x4e0   :  { %v878_v29 = vsel %vm244_vm10, %v876_v24, 0.0 }
 0x4e1   :  { %537 = vadd.xlane.f32.xlu0 %v536_v17  ;;  %651 = vadd.xlane.f32.xlu2 %v650_v18 }
 0x4e7   :  { %v1104_v31 = vpop.permute.xlu0 %1103 }
 0x4e8   :  { %v1106_v34 = vsel %vm244_vm10, %v1104_v31, 0.0 }
 0x4e9   :  { %765 = vadd.xlane.f32.xlu2 %v764_v21 }
 0x4f6   :  { %v1047_v35 = vpop.permute.xlu0 %1046 }
 0x4f7   :  { %v1049_v39 = vsel %vm244_vm10, %v1047_v35, 0.0 }
 0x4fe   :  { %v705_v22 = vpop.permute.xlu1 %704 }
 0x4ff   :  { %v707_v23 = vsel %vm244_vm10, %v705_v22, 0.0 }
 0x500   :  { %708 = vadd.xlane.f32.xlu0 %v707_v23 }
 0x506   :  { %v819_v25 = vpop.permute.xlu1 %818 }
 0x507   :  { %v821_v27 = vsel %vm244_vm10, %v819_v25, 0.0 }
 0x508   :  { %822 = vadd.xlane.f32.xlu1 %v821_v27  ;;  %879 = vadd.xlane.f32.xlu0 %v878_v29 }
 0x50e   :  { %v990_v32 = vpop.permute.xlu1 %989 }
 0x50f   :  { %v992_v33 = vsel %vm244_vm10, %v990_v32, 0.0 }
 0x510   :  { %993 = vadd.xlane.f32.xlu1 %v992_v33  ;;  %1107 = vadd.xlane.f32.xlu0 %v1106_v34 }
 0x518   :  { %1050 = vadd.xlane.f32.xlu0 %v1049_v39 }
 0x521   :  { %v253_v41 = vpop.xlane.xlu0 %252 }
 0x522   :  { %1336 = vrcp.f32 %v253_v41  ;;  %v265_v51 = vand.u32 2147483648, %v253_v41  ;;  %v263_v53 = vand.u32 2147483647, %v253_v41  ;;  %vm259_vm11 = vweird.f32 %v253_v41 }
 0x524   :  { %v266_v55 = vor.u32 1.1754944e-38, %v265_v51  ;;  %vm264_vm13 = vcmp.eq.f32.partialorder %v263_v53, 8.507059e+37 }
 0x528   :  { %v1337_v42 = vpop.eup %1336 }
 0x529   :  { %v255_v43 = vmul.f32 %v1337_v42, %v253_v41  ;;  %vm260_vm9 = vweird.f32 %v1337_v42 }
 0x52a   :  { %vm261_vm12 = vmor %vm259_vm11, %vm260_vm9 }
 0x52b   :  { %v256_v47 = vsub.f32 1.0, %v255_v43 }
 0x52d   :  { %v257_v52 = vmul.f32 %v1337_v42, %v256_v47 }
 0x52f   :  { %v258_v54 = vadd.f32 %v1337_v42, %v257_v52 }
 0x531   :  { %v262_v57 = vsel %vm261_vm12, %v1337_v42, %v258_v54 }
 0x532   :  { %v267_v58 = vsel %vm264_vm13, %v266_v55, %v262_v57  ;;  %v310_v59 = vpop.xlane.xlu2 %309 }
 0x533   :  { %v268_v61 = vmul.f32 %v1586_v3, %v267_v58  ;;  %1338 = vrcp.f32 %v310_v59  ;;  %v322_v6 = vand.u32 2147483648, %v310_v59  ;;  %v320_v8 = vand.u32 2147483647, %v310_v59 }
 0x534   :  { %vm316_vm0 = vweird.f32 %v310_v59 }
 0x535   :  { %1251 = vmatmul.msk.f32.vlgmr.msrb.gmra.mxu3 %vm269_vm14, %v268_v61  ;;  %v323_v50 = vor.u32 1.1754944e-38, %v322_v6  ;;  %vm321_vm2 = vcmp.eq.f32.partialorder %v320_v8, 8.507059e+37 }
 0x539   :  { %v1339_v62 = vpop.eup %1338 }
 0x53a   :  { %v312_v1 = vmul.f32 %v1339_v62, %v310_v59  ;;  %vm317_vm15 = vweird.f32 %v1339_v62 }
 0x53b   :  { %v367_v2 = vpop.xlane.xlu2 %366  ;;  %vm318_vm1 = vmor %vm316_vm0, %vm317_vm15 }
 0x53c   :  { %v313_v4 = vsub.f32 1.0, %v312_v1  ;;  %1340 = vrcp.f32 %v367_v2  ;;  %v379_v17 = vand.u32 2147483648, %v367_v2  ;;  %v377_v18 = vand.u32 2147483647, %v367_v2 }
 0x53d   :  { %vm373_vm4 = vweird.f32 %v367_v2 }
 0x53e   :  { %v314_v7 = vmul.f32 %v1339_v62, %v313_v4  ;;  %v380_v22 = vor.u32 1.1754944e-38, %v379_v17  ;;  %vm378_vm6 = vcmp.eq.f32.partialorder %v377_v18, 8.507059e+37 }
 0x540   :  { %v315_v9 = vadd.f32 %v1339_v62, %v314_v7 }
 0x542   :  { %v1341_v5 = vpop.eup %1340  ;;  %v319_v11 = vsel %vm318_vm1, %v1339_v62, %v315_v9 }
 0x543   :  { %v369_v3 = vmul.f32 %v1341_v5, %v367_v2  ;;  %v324_v13 = vsel %vm321_vm2, %v323_v50, %v319_v11  ;;  %vm374_vm3 = vweird.f32 %v1341_v5 }
 0x544   :  { %v424_v12 = vpop.xlane.xlu0 %423  ;;  %v325_v14 = vmul.f32 %v1508_v10, %v324_v13  ;;  %vm375_vm5 = vmor %vm373_vm4, %vm374_vm3 }
 0x545   :  { %1342 = vrcp.f32 %v424_v12  ;;  %v370_v15 = vsub.f32 1.0, %v369_v3  ;;  %v436_v33 = vand.u32 2147483648, %v424_v12  ;;  %vm430_vm9 = vweird.f32 %v424_v12 }
 0x546   :  { %327 = vrot.lane.b32.xlu2 %v325_v14, %s1394_s3  ;;  %v434_v35 = vand.u32 2147483647, %v424_v12 }
 0x547   :  { %v371_v16 = vmul.f32 %v1341_v5, %v370_v15  ;;  %v437_v47 = vor.u32 1.1754944e-38, %v436_v33 }
 0x548   :  { %vm435_vm12 = vcmp.eq.f32.partialorder %v434_v35, 8.507059e+37 }
 0x549   :  { %v372_v19 = vadd.f32 %v1341_v5, %v371_v16 }
 0x54b   :  { %v1343_v21 = vpop.eup %1342  ;;  %v376_v27 = vsel %vm375_vm5, %v1341_v5, %v372_v19 }
 0x54c   :  { %v426_v23 = vmul.f32 %v1343_v21, %v424_v12  ;;  %v595_v24 = vpop.xlane.xlu2 %594  ;;  %v481_v25 = vpop.xlane.xlu0 %480  ;;  %v381_v10 = vsel %vm378_vm6, %v380_v22, %v376_v27  ;;  %vm431_vm7 = vweird.f32 %v1343_v21 }
 0x54d   :  { %1344 = vrcp.f32 %v595_v24  ;;  %v382_v31 = vmul.f32 %v1515_v20, %v381_v10  ;;  %vm432_vm11 = vmor %vm430_vm9, %vm431_vm7  ;;  %v607_v55 = vand.u32 2147483648, %v595_v24  ;;  %v493_v59 = vand.u32 2147483648, %v481_v25 }
 0x54e   :  { %v427_v29 = vsub.f32 1.0, %v426_v23  ;;  %1346 = vrcp.f32 %v481_v25  ;;  %v605_v61 = vand.u32 2147483647, %v595_v24  ;;  %vm601_vm15 = vweird.f32 %v595_v24 }
 0x54f   :  { %384 = vrot.lane.b32.xlu1 %v382_v31, %s1395_s5  ;;  %v491_v1 = vand.u32 2147483647, %v481_v25  ;;  %v608_v7 = vor.u32 1.1754944e-38, %v607_v55  ;;  %vm487_vm2 = vweird.f32 %v481_v25 }
 0x550   :  { %v428_v32 = vmul.f32 %v1343_v21, %v427_v29  ;;  %vm606_vm3 = vcmp.eq.f32.partialorder %v605_v61, 8.507059e+37 }
 0x551   :  { %vm492_vm5 = vcmp.eq.f32.partialorder %v491_v1, 8.507059e+37 }
 0x552   :  { %v429_v34 = vadd.f32 %v1343_v21, %v428_v32 }
 0x553   :  { %v1345_v37 = vpop.eup %1344 }
 0x554   :  { %v1347_v39 = vpop.eup %1346  ;;  %v597_v40 = vmul.f32 %v1345_v37, %v595_v24  ;;  %v1617_v41 = vpop.xlane.xlu2 %651  ;;  %v433_v43 = vsel %vm432_vm11, %v1343_v21, %v429_v34  ;;  %vm602_vm13 = vweird.f32 %v1345_v37 }
 0x555   :  { %v538_v42 = vpop.xlane.xlu0 %537  ;;  %v483_v51 = vmul.f32 %v1347_v39, %v481_v25  ;;  %1348 = vrcp.f32 %v1617_v41  ;;  %v438_v53 = vsel %vm435_vm12, %v437_v47, %v433_v43  ;;  %vm488_vm0 = vweird.f32 %v1347_v39  ;;  %vm603_vm1 = vmor %vm601_vm15, %vm602_vm13 }
 0x556   :  { %v598_v20 = vsub.f32 1.0, %v597_v40  ;;  %1350 = vrcp.f32 %v538_v42  ;;  %v439_v57 = vmul.f32 %v1529_v30, %v438_v53  ;;  %v494_v30 = vor.u32 1.1754944e-38, %v493_v59  ;;  %vm489_vm4 = vmor %vm487_vm2, %vm488_vm0 }
 0x557   :  { %v484_v52 = vsub.f32 1.0, %v483_v51  ;;  %v550_v15 = vand.u32 2147483648, %v538_v42  ;;  %v548_v18 = vand.u32 2147483647, %v538_v42  ;;  %vm544_vm7 = vweird.f32 %v538_v42 }
 0x558   :  { %v599_v54 = vmul.f32 %v1345_v37, %v598_v20  ;;  %441 = vrot.lane.b32.xlu2 %v439_v57, %s1398_s17  ;;  %v664_v25 = vand.u32 2147483648, %v1617_v41  ;;  %vm658_vm13 = vweird.f32 %v1617_v41  ;;  %v662_v27 = vand.u32 2147483647, %v1617_v41 }
 0x559   :  { %v485_v58 = vmul.f32 %v1347_v39, %v484_v52  ;;  %v551_v22 = vor.u32 1.1754944e-38, %v550_v15  ;;  %vm549_vm11 = vcmp.eq.f32.partialorder %v548_v18, 8.507059e+37 }
 0x55a   :  { %v600_v62 = vadd.f32 %v1345_v37, %v599_v54  ;;  %v665_v10 = vor.u32 1.1754944e-38, %v664_v25  ;;  %vm663_vm0 = vcmp.eq.f32.partialorder %v662_v27, 8.507059e+37  ;;  %v237_v54 = vld [vmem:[%s1815_s6 + $0x8] sm:$0xff] }
 0x55b   :  { %v1349_v2 = vpop.eup %1348  ;;  %v486_v4 = vadd.f32 %v1347_v39, %v485_v58  ;;  %v443_v61 = vrot.slane %v237_v54, 4  ;;  %1254 = vmatpush.msk.msra.mxu1 %vm273_vm8, %v237_v54 }
 0x55c   :  { %v1351_v6 = vpop.eup %1350  ;;  %v654_v8 = vmul.f32 %v1349_v2, %v1617_v41  ;;  %v604_v9 = vsel %vm603_vm1, %v1345_v37, %v600_v62  ;;  %vm659_vm12 = vweird.f32 %v1349_v2  ;;  %v1632_v31 = vpop.xlane.xlu2 %765 }
 0x55d   :  { %v540_v50 = vmul.f32 %v1351_v6, %v538_v42  ;;  %v609_v11 = vsel %vm606_vm3, %v608_v7, %v604_v9  ;;  %v490_v3 = vsel %vm489_vm4, %v1347_v39, %v486_v4  ;;  %vm545_vm6 = vweird.f32 %v1351_v6  ;;  %vm660_vm15 = vmor %vm658_vm13, %vm659_vm12  ;;  %1256 = vmatpush.msk.msra.mxu2 %vm273_vm8, %v443_v61 }
 0x55e   :  { %v655_v5 = vsub.f32 1.0, %v654_v8  ;;  %v610_v13 = vmul.f32 %v1537_v36, %v609_v11  ;;  %v495_v14 = vsel %vm492_vm5, %v494_v30, %v490_v3  ;;  %vm546_vm9 = vmor %vm544_vm7, %vm545_vm6  ;;  %1352 = vrcp.f32 %v1632_v31  ;;  %v239_v3 = vld [vmem:[%s1815_s6 + $0x18] sm:$0xff] }
 0x55f   :  { %v541_v12 = vsub.f32 1.0, %v540_v50  ;;  %v496_v16 = vmul.f32 %v1523_v26, %v495_v14  ;;  %vm772_vm6 = vweird.f32 %v1632_v31  ;;  %v776_v50 = vand.u32 2147483647, %v1632_v31  ;;  %1262 = vmatpush.msk.msrb.mxu1 %vm273_vm8, %v239_v3 }
 0x560   :  { %612 = vrot.lane.b32.xlu0 %v610_v13, %s1400_s19  ;;  %v656_v19 = vmul.f32 %v1349_v2, %v655_v5 }
 0x561   :  { %v542_v17 = vmul.f32 %v1351_v6, %v541_v12  ;;  %498 = vrot.lane.b32.xlu2 %v496_v16, %s1396_s15  ;;  %vm777_vm12 = vcmp.eq.f32.partialorder %v776_v50, 8.507059e+37  ;;  %s1410_s15 = smov 64  }
 0x562   :  { %v657_v36 = vadd.f32 %v1349_v2, %v656_v19 }
 0x563   :  { %v543_v21 = vadd.f32 %v1351_v6, %v542_v17 }
 0x564   :  { %v661_v29 = vsel %vm660_vm15, %v1349_v2, %v657_v36  ;;  %v1637_v34 = vpop.eup %1352 }
 0x565   :  { %v547_v23 = vsel %vm546_vm9, %v1351_v6, %v543_v21  ;;  %v666_v32 = vsel %vm663_vm0, %v665_v10, %v661_v29  ;;  %v768_v35 = vmul.f32 %v1637_v34, %v1632_v31  ;;  %vm773_vm5 = vweird.f32 %v1637_v34 }
 0x566   :  { %v552_v24 = vsel %vm549_vm11, %v551_v22, %v547_v23  ;;  %v667_v33 = vmul.f32 %v1539_v38, %v666_v32  ;;  %v778_v6 = vand.u32 2147483648, %v1632_v31  ;;  %vm1672_vm7 = vmor %vm772_vm6, %vm773_vm5 }
 0x567   :  { %v553_v26 = vmul.f32 %v1525_v28, %v552_v24  ;;  %v769_v42 = vsub.f32 1.0, %v768_v35 }
 0x568   :  { %v779_v15 = vor.u32 1.1754944e-38, %v778_v6 }
 0x569   :  { %555 = vrot.lane.b32.xlu2 %v553_v26, %s1397_s16  ;;  %v770_v51 = vmul.f32 %v1637_v34, %v769_v42  ;;  %s1411_s16 = smov [#allocation2]  }
 0x56a   :  { %s1232_s17 = sshll.u32 %s1411_s16, 4  ;;  %s1233_s17 = int_to_ptr.vmem [resolvable:$true] %s1232_s17 }
 0x56b   :  { %v771_v4 = vadd.f32 %v1637_v34, %v770_v51 }
 0x56d   :  { %v775_v12 = vsel %vm1672_vm7, %v1637_v34, %v771_v4 }
 0x56e   :  { %v780_v24 = vsel %vm777_vm12, %v779_v15, %v775_v12  ;;  %v671_v12 = vrot.slane %v239_v3, 4 }
 0x56f   :  { %v781_v10 = vmul.f32 %v1549_v45, %v780_v24 }
 0x570   :  { %1264 = vmatpush.msk.msrb.mxu2 %vm273_vm8, %v671_v12 }
 0x571   :  { %669 = vrot.lane.b32.xlu2 %v667_v33, %s1399_s18 }
 0x573   :  { %v709_v28 = vpop.xlane.xlu0 %708 }
 0x574   :  { %1354 = vrcp.f32 %v709_v28  ;;  %v721_v47 = vand.u32 2147483648, %v709_v28  ;;  %vm715_vm2 = vweird.f32 %v709_v28  ;;  %v719_v52 = vand.u32 2147483647, %v709_v28 }
 0x576   :  { %v722_v1 = vor.u32 1.1754944e-38, %v721_v47  ;;  %vm720_vm4 = vcmp.eq.f32.partialorder %v719_v52, 8.507059e+37 }
 0x57a   :  { %v1355_v37 = vpop.eup %1354 }
 0x57b   :  { %v711_v39 = vmul.f32 %v1355_v37, %v709_v28  ;;  %v1641_v40 = vpop.xlane.xlu1 %822  ;;  %v880_v41 = vpop.xlane.xlu0 %879  ;;  %vm716_vm1 = vweird.f32 %v1355_v37 }
 0x57c   :  { %1356 = vrcp.f32 %v880_v41  ;;  %vm1645_vm3 = vmor %vm715_vm2, %vm716_vm1  ;;  %v892_v11 = vand.u32 2147483648, %v880_v41  ;;  %v890_v13 = vand.u32 2147483647, %v880_v41  ;;  %vm886_vm11 = vweird.f32 %v880_v41 }
 0x57d   :  { %v712_v43 = vsub.f32 1.0, %v711_v39  ;;  %1358 = vrcp.f32 %v1641_v40  ;;  %vm829_vm0 = vweird.f32 %v1641_v40  ;;  %v835_v35 = vand.u32 2147483648, %v1641_v40 }
 0x57e   :  { %v893_v22 = vor.u32 1.1754944e-38, %v892_v11  ;;  %v833_v42 = vand.u32 2147483647, %v1641_v40 }
 0x57f   :  { %v713_v38 = vmul.f32 %v1355_v37, %v712_v43  ;;  %v836_v61 = vor.u32 1.1754944e-38, %v835_v35 }
 0x581   :  { %v714_v20 = vadd.f32 %v1355_v37, %v713_v38 }
 0x582   :  { %v1357_v55 = vpop.eup %1356 }
 0x583   :  { %v1652_v57 = vpop.xlane.xlu1 %993  ;;  %v1654_v58 = vpop.xlane.xlu0 %1107  ;;  %v718_v59 = vsel %vm1645_vm3, %v1355_v37, %v714_v20  ;;  %v882_v2 = vmul.f32 %v1357_v55, %v880_v41  ;;  %vm887_vm9 = vweird.f32 %v1357_v55 }
 0x584   :  { %v1659_v62 = vpop.eup %1358  ;;  %1360 = vrcp.f32 %v1652_v57  ;;  %v723_v8 = vsel %vm720_vm4, %v722_v1, %v718_v59  ;;  %vm888_vm13 = vmor %vm886_vm11, %vm887_vm9  ;;  %v1120_v29 = vand.u32 2147483648, %v1654_v58  ;;  %v1118_v33 = vand.u32 2147483647, %v1654_v58 }
 0x585   :  { %1362 = vrcp.f32 %v1654_v58  ;;  %v883_v7 = vsub.f32 1.0, %v882_v2  ;;  %v825_v9 = vmul.f32 %v1659_v62, %v1641_v40  ;;  %v724_v30 = vmul.f32 %v1571_v60, %v723_v8  ;;  %v238_v40 = vld [vmem:[%s1815_s6 + $0x10] sm:$0xff] }
 0x586   :  { %v935_v60 = vsel %vm244_vm10, %v1609_v46, 0.0  ;;  %vm891_vm10 = vcmp.eq.f32.partialorder %v890_v13, 8.507059e+37  ;;  %vm1114_vm1 = vweird.f32 %v1654_v58  ;;  %v1121_v37 = vor.u32 1.1754944e-38, %v1120_v29  ;;  %1258 = vmatpush.msk.msra.mxu3 %vm273_vm8, %v238_v40 }
 0x587   :  { %v884_v5 = vmul.f32 %v1357_v55, %v883_v7  ;;  %726 = vrot.lane.b32.xlu1 %v724_v30, %s1406_s25  ;;  %v826_v18 = vsub.f32 1.0, %v825_v9  ;;  %vm830_vm3 = vweird.f32 %v1659_v62  ;;  %vm1000_vm4 = vweird.f32 %v1652_v57 }
 0x588   :  { %vm1119_vm5 = vcmp.eq.f32.partialorder %v1118_v33, 8.507059e+37  ;;  %v1006_v51 = vand.u32 2147483648, %v1652_v57  ;;  %vm1714_vm7 = vmor %vm829_vm0, %vm830_vm3  ;;  %v1004_v54 = vand.u32 2147483647, %v1652_v57  ;;  %vm834_vm11 = vcmp.eq.f32.partialorder %v833_v42, 8.507059e+37 }
 0x589   :  { %v885_v16 = vadd.f32 %v1357_v55, %v884_v5  ;;  %v827_v27 = vmul.f32 %v1659_v62, %v826_v18 }
 0x58a   :  { %v1680_v14 = vpop.eup %1360  ;;  %936 = vadd.xlane.f32.xlu0 %v935_v60  ;;  %v1007_v2 = vor.u32 1.1754944e-38, %v1006_v51 }
 0x58b   :  { %v1363_v17 = vpop.eup %1362  ;;  %v996_v19 = vmul.f32 %v1680_v14, %v1652_v57  ;;  %v1686_v21 = vpop.xlane.xlu0 %1050  ;;  %v889_v36 = vsel %vm888_vm13, %v1357_v55, %v885_v16  ;;  %v828_v39 = vadd.f32 %v1659_v62, %v827_v27  ;;  %vm1001_vm6 = vweird.f32 %v1680_v14  ;;  %v243_v16 = vld [vmem:[%s1815_s6 + $0x38] sm:$0xff] }
 0x58c   :  { %v1110_v23 = vmul.f32 %v1363_v17, %v1654_v58  ;;  %1364 = vrcp.f32 %v1686_v21  ;;  %v894_v26 = vsel %vm891_vm10, %v893_v22, %v889_v36  ;;  %vm1115_vm15 = vweird.f32 %v1363_v17  ;;  %vm1725_vm12 = vmor %vm1000_vm4, %vm1001_vm6  ;;  %v242_v22 = vld [vmem:[%s1815_s6 + $0x30] sm:$0xff] }
 0x58d   :  { %v997_v46 = vsub.f32 1.0, %v996_v19  ;;  %v895_v31 = vmul.f32 %v1547_v44, %v894_v26  ;;  %vm1116_vm2 = vmor %vm1114_vm1, %vm1115_vm15  ;;  %v1063_v20 = vand.u32 2147483648, %v1686_v21  ;;  %v832_v58 = vsel %vm1714_vm7, %v1659_v62, %v828_v39  ;;  %v240_v19 = vld [vmem:[%s1815_s6 + $0x20] sm:$0xff] }
 0x58e   :  { %v1111_v25 = vsub.f32 1.0, %v1110_v23  ;;  %v1061_v59 = vand.u32 2147483647, %v1686_v21  ;;  %vm1057_vm13 = vweird.f32 %v1686_v21  ;;  %v557_v57 = vrot.slane %v238_v40, 4  ;;  %1266 = vmatpush.msk.msrb.mxu3 %vm273_vm8, %v240_v19 }
 0x58f   :  { %v998_v28 = vmul.f32 %v1680_v14, %v997_v46  ;;  %783 = vrot.lane.b32.xlu1 %v781_v10, %s1401_s20  ;;  %897 = vrot.lane.b32.xlu2 %v895_v31, %s1402_s21  ;;  %v1064_v4 = vor.u32 1.1754944e-38, %v1063_v20  ;;  %v837_v6 = vsel %vm834_vm11, %v836_v61, %v832_v58  ;;  %vm1005_vm15 = vcmp.eq.f32.partialorder %v1004_v54, 8.507059e+37  ;;  %s1234_s20 = sshll.u32 %s1816_s7, 4  ;;  %s1235_s20 = int_to_ptr.hbm [resolvable:$true] %s1234_s20 }
 0x590   :  { %v1112_v32 = vmul.f32 %v1363_v17, %v1111_v25  ;;  %vm1062_vm0 = vcmp.eq.f32.partialorder %v1061_v59, 8.507059e+37  ;;  %1260 = vmatpush.msk.msrb.mxu0 %vm273_vm8, %v557_v57  ;;  %v838_v30 = vmul.f32 %v1576_v63, %v837_v6  ;;  %v241_v63 = vld [vmem:[%s1815_s6 + $0x28] sm:$0xff]  ;;  %v1013_v24 = vrot.slane %v242_v22, 4  ;;  %s1409_s6 = smov 32  }
 0x591   :  { %v999_v47 = vadd.f32 %v1680_v14, %v998_v28  ;;  %vm1204_vm6 = vcmask 785408  }
 0x592   :  { %v1365_v34 = vpop.eup %1364  ;;  %v1113_v45 = vadd.f32 %v1363_v17, %v1112_v32 }
 0x593   :  { %v1053_v44 = vmul.f32 %v1365_v34, %v1686_v21  ;;  %vm1058_vm9 = vweird.f32 %v1365_v34  ;;  %v1003_v62 = vsel %vm1725_vm12, %v1680_v14, %v999_v47  ;;  %v785_v21 = vrot.slane %v240_v19, 4 }
 0x594   :  { %v1117_v41 = vsel %vm1116_vm2, %v1363_v17, %v1113_v45  ;;  %vm1059_vm10 = vmor %vm1057_vm13, %vm1058_vm9  ;;  %v1008_v8 = vsel %vm1005_vm15, %v1007_v2, %v1003_v62  ;;  %v1127_v17 = vrot.slane %v243_v16, 4 }
 0x595   :  { %v1054_v43 = vsub.f32 1.0, %v1053_v44  ;;  %v1122_v38 = vsel %vm1119_vm5, %v1121_v37, %v1117_v41  ;;  %v1009_v5 = vmul.f32 %v1580_v0, %v1008_v8  ;;  %v899_v0 = vrot.slane %v241_v63, 4 }
 0x596   :  { %v1123_v52 = vmul.f32 %v1557_v49, %v1122_v38  ;;  %vm1200_vm5 = vcmask 261120  }
 0x597   :  { %v1055_v55 = vmul.f32 %v1365_v34, %v1054_v43 }
 0x598   :  { %1125 = vrot.lane.b32.xlu2 %v1123_v52, %s1404_s23 }
 0x599   :  { %v1056_v1 = vadd.f32 %v1365_v34, %v1055_v55 }
 0x59b   :  { %v1060_v7 = vsel %vm1059_vm10, %v1365_v34, %v1056_v1 }
 0x59c   :  { %v1065_v9 = vsel %vm1062_vm0, %v1064_v4, %v1060_v7 }
 0x59d   :  { %v1066_v50 = vmul.f32 %v1565_v56, %v1065_v9 }
 0x59e   :  { %840 = vrot.lane.b32.xlu0 %v838_v30, %s1407_s26 }
 0x59f   :  { %1068 = vrot.lane.b32.xlu1 %v1066_v50, %s1405_s24 }
 0x5a0   :  { %1011 = vrot.lane.b32.xlu2 %v1009_v5, %s1408_s27  ;;  %v328_v11 = vpop.permute.xlu2 %327 }
 0x5a1   :  { %1253 = vmatmul.msk.f32.vlgmr.msra.gmra.mxu0 %vm269_vm14, %v328_v11 }
 0x5a2   :  { %1268 = vmatpush.msk.msra.mxu0 %vm273_vm8, %v785_v21 }
 0x5b2   :  { %v442_v56 = vpop.permute.xlu2 %441 }
 0x5b3   :  { %1257 = vmatmul.msk.f32.vlgmr.msra.gmra.mxu2 %vm269_vm14, %v442_v56 }
 0x5b4   :  { %1272 = vmatpush.msk.msra.mxu2 %vm273_vm8, %v899_v0 }
 0x5b8   :  { %v294_v49 = vpop.f32.mrf.mxu3 }
 0x5bb   :  { %v499_v13 = vpop.permute.xlu2 %498 }
 0x5bc   :  { %1259 = vmatmul.msk.f32.vlgmr.msra.gmra.mxu3 %vm269_vm14, %v499_v13 }
 0x5bd   :  { %1274 = vmatpush.msk.msra.mxu3 %vm273_vm8, %v242_v22 }
 0x5c1   :  { %v385_v14 = vpop.permute.xlu1 %384 }
 0x5c2   :  { %1255 = vmatmul.msk.f32.vlgmr.msra.gmra.mxu1 %vm269_vm14, %v385_v14 }
 0x5c3   :  { %v556_v15 = vpop.permute.xlu2 %555  ;;  %1270 = vmatpush.msk.msra.mxu1 %vm273_vm8, %v241_v63 }
 0x5c4   :  { %1261 = vmatmul.msk.f32.vlgmr.msrb.gmra.mxu0 %vm269_vm14, %v556_v15 }
 0x5c5   :  { %1276 = vmatpush.msk.msrb.mxu0 %vm273_vm8, %v1013_v24 }
 0x5cb   :  { %v670_v60 = vpop.permute.xlu2 %669 }
 0x5cc   :  { %1265 = vmatmul.msk.f32.vlgmr.msrb.gmra.mxu2 %vm269_vm14, %v670_v60 }
 0x5cd   :  { %1280 = vmatpush.msk.msrb.mxu2 %vm273_vm8, %v1127_v17 }
 0x5d2   :  { %v613_v18 = vpop.permute.xlu0 %612 }
 0x5d3   :  { %1263 = vmatmul.msk.f32.vlgmr.msrb.gmra.mxu1 %vm269_vm14, %v613_v18 }
 0x5d4   :  { %1278 = vmatpush.msk.msrb.mxu1 %vm273_vm8, %v243_v16 }
 0x5e9   :  { %v898_v23 = vpop.permute.xlu2 %897 }
 0x5ea   :  { %1273 = vmatmul.msk.f32.vlgmr.msra.gmra.mxu2 %vm269_vm14, %v898_v23 }
 0x5f2   :  { %v1126_v46 = vpop.permute.xlu2 %1125 }
 0x5f3   :  { %1281 = vmatmul.msk.f32.vlgmr.msrb.gmra.mxu2 %vm269_vm14, %v1126_v46 }
 0x5f9   :  { %v727_v36 = vpop.permute.xlu1 %726 }
 0x5fa   :  { %1267 = vmatmul.msk.f32.vlgmr.msrb.gmra.mxu3 %vm269_vm14, %v727_v36  ;;  %v1012_v28 = vpop.permute.xlu2 %1011 }
 0x5fd   :  { %v937_v25 = vpop.xlane.xlu0 %936 }
 0x5fe   :  { %1366 = vrcp.f32 %v937_v25  ;;  %v949_v31 = vand.u32 2147483648, %v937_v25  ;;  %v947_v33 = vand.u32 2147483647, %v937_v25  ;;  %vm943_vm2 = vweird.f32 %v937_v25 }
 0x600   :  { %v950_v35 = vor.u32 1.1754944e-38, %v949_v31  ;;  %vm948_vm4 = vcmp.eq.f32.partialorder %v947_v33, 8.507059e+37 }
 0x601   :  { %v784_v26 = vpop.permute.xlu1 %783 }
 0x602   :  { %1269 = vmatmul.msk.f32.vlgmr.msra.gmra.mxu0 %vm269_vm14, %v784_v26 }
 0x604   :  { %v1367_v27 = vpop.eup %1366 }
 0x605   :  { %v939_v29 = vmul.f32 %v1367_v27, %v937_v25  ;;  %vm944_vm1 = vweird.f32 %v1367_v27 }
 0x606   :  { %vm945_vm3 = vmor %vm943_vm2, %vm944_vm1 }
 0x607   :  { %v940_v10 = vsub.f32 1.0, %v939_v29 }
 0x609   :  { %v941_v32 = vmul.f32 %v1367_v27, %v940_v10 }
 0x60a   :  { %1277 = vmatmul.msk.f32.vlgmr.msrb.gmra.mxu0 %vm269_vm14, %v1012_v28 }
 0x60b   :  { %v942_v34 = vadd.f32 %v1367_v27, %v941_v32 }
 0x60d   :  { %v946_v45 = vsel %vm945_vm3, %v1367_v27, %v942_v34 }
 0x60e   :  { %v951_v37 = vsel %vm948_vm4, %v950_v35, %v946_v45 }
 0x60f   :  { %v952_v44 = vmul.f32 %v1555_v48, %v951_v37 }
 0x610   :  { %v841_v39 = vpop.permute.xlu0 %840 }
 0x611   :  { %954 = vrot.lane.b32.xlu2 %v952_v44, %s1403_s22  ;;  %1271 = vmatmul.msk.f32.vlgmr.msra.gmra.mxu1 %vm269_vm14, %v841_v39  ;;  %v1069_v41 = vpop.permute.xlu1 %1068 }
 0x619   :  { %1279 = vmatmul.msk.f32.vlgmr.msrb.gmra.mxu1 %vm269_vm14, %v1069_v41 }
 0x61e   :  { %v351_v42 = vpop.f32.mrf.mxu0 }
 0x61f   :  { %1153 = vrot.lane.b32.xlu1 %v351_v42, %s1409_s6 }
 0x636   :  { %v465_v43 = vpop.f32.mrf.mxu2 }
 0x637   :  { %1161 = vrot.lane.b32.xlu2 %v465_v43, %s1406_s25 }
 0x63f   :  { %v408_v38 = vpop.f32.mrf.mxu1  ;;  %v522_v57 = vpop.f32.mrf.mxu3 }
 0x640   :  { %1157 = vrot.lane.b32.xlu0 %v408_v38, %s1410_s15 }
 0x641   :  { %v579_v47 = vpop.f32.mrf.mxu0 }
 0x642   :  { %1165 = vrot.lane.b32.xlu1 %v579_v47, %s1409_s6 }
 0x64f   :  { %v693_v48 = vpop.f32.mrf.mxu2 }
 0x650   :  { %1173 = vrot.lane.b32.xlu2 %v693_v48, %s1406_s25  ;;  %v636_v51 = vpop.f32.mrf.mxu1 }
 0x651   :  { %1169 = vrot.lane.b32.xlu0 %v636_v51, %s1410_s15 }
 0x66b   :  { %v955_v20 = vpop.permute.xlu2 %954 }
 0x66c   :  { %1275 = vmatmul.msk.f32.vlgmr.msra.gmra.mxu3 %vm269_vm14, %v955_v20  ;;  %vm1202_vm14 = vcmask 523264  }
 0x66d   :  { %v921_v52 = vpop.f32.mrf.mxu2 }
 0x66e   :  { %1185 = vrot.lane.b32.xlu2 %v921_v52, %s1406_s25 }
 0x676   :  { %v1149_v53 = vpop.f32.mrf.mxu2 }
 0x677   :  { %1197 = vrot.lane.b32.xlu2 %v1149_v53, %s1406_s25 }
 0x67d   :  { %v750_v12 = vpop.f32.mrf.mxu3 }
 0x67f   :  { %v807_v54 = vpop.f32.mrf.mxu0 }
 0x680   :  { %1177 = vrot.lane.b32.xlu1 %v807_v54, %s1409_s6 }
 0x687   :  { %v1035_v55 = vpop.f32.mrf.mxu0 }
 0x688   :  { %1189 = vrot.lane.b32.xlu1 %v1035_v55, %s1409_s6 }
 0x68e   :  { %v864_v58 = vpop.f32.mrf.mxu1 }
 0x68f   :  { %1181 = vrot.lane.b32.xlu0 %v864_v58, %s1410_s15 }
 0x691   :  { %v1154_v61 = vpop.permute.xlu1 %1153  ;;  %v1162_v62 = vpop.permute.xlu2 %1161 }
 0x692   :  { %v1201_v2 = vsel %vm1200_vm5, %v294_v49, %v1154_v61 }
 0x696   :  { %v1092_v59 = vpop.f32.mrf.mxu1 }
 0x697   :  { %1193 = vrot.lane.b32.xlu0 %v1092_v59, %s1410_s15 }
 0x6aa   :  { %v1174_v7 = vpop.permute.xlu2 %1173 }
 0x6b2   :  { %v1158_v40 = vpop.permute.xlu0 %1157 }
 0x6b3   :  { %v1203_v8 = vsel %vm1202_vm14, %v1201_v2, %v1158_v40 }
 0x6b4   :  { %v1166_v1 = vpop.permute.xlu1 %1165  ;;  %v1205_v5 = vsel %vm1204_vm6, %v1203_v8, %v1162_v62 }
 0x6b5   :  { %v1206_v4 = vsel %vm1200_vm5, %v522_v57, %v1166_v1 }
 0x6c3   :  { %v1170_v6 = vpop.permute.xlu0 %1169 }
 0x6c4   :  { %v1207_v9 = vsel %vm1202_vm14, %v1206_v4, %v1170_v6 }
 0x6c5   :  { %v1208_v30 = vsel %vm1204_vm6, %v1207_v9, %v1174_v7 }
 0x6c6   :  { %v1219_v50 = vrot.slane %v1208_v30, 4 }
 0x6c8   :  { %v1221_v11 = vsel %vm273_vm8, %v1205_v5, %v1219_v50  ;;  %v1186_v56 = vpop.permute.xlu2 %1185 }
 0x6c9   :  { %1225 = vst [vmem:[#allocation2] sm:$0xff] %v1221_v11 }
 0x6d1   :  { %v1198_v16 = vpop.permute.xlu2 %1197 }
 0x6ef   :  { %v978_v13 = vpop.f32.mrf.mxu3 }
 0x6f2   :  { %v1178_v3 = vpop.permute.xlu1 %1177 }
 0x6f3   :  { %v1209_v14 = vsel %vm1200_vm5, %v750_v12, %v1178_v3 }
 0x6fa   :  { %v1190_v0 = vpop.permute.xlu1 %1189 }
 0x6fb   :  { %v1212_v15 = vsel %vm1200_vm5, %v978_v13, %v1190_v0 }
 0x701   :  { %v1182_v63 = vpop.permute.xlu0 %1181 }
 0x702   :  { %v1210_v17 = vsel %vm1202_vm14, %v1209_v14, %v1182_v63 }
 0x703   :  { %v1211_v22 = vsel %vm1204_vm6, %v1210_v17, %v1186_v56 }
 0x709   :  { %v1194_v60 = vpop.permute.xlu0 %1193 }
 0x70a   :  { %v1213_v18 = vsel %vm1202_vm14, %v1212_v15, %v1194_v60 }
 0x70b   :  { %v1214_v19 = vsel %vm1204_vm6, %v1213_v18, %v1198_v16 }
 0x70c   :  { %v1220_v21 = vrot.slane %v1214_v19, 4 }
 0x70e   :  { %v1222_v23 = vsel %vm273_vm8, %v1211_v22, %v1220_v21 }
 0x70f   :  { %1226 = vst [vmem:[#allocation2 + $0x8] sm:$0xff] %v1222_v23 }
 0x710   :  { %1237 = dma.vmem_to_hbm [thread:$0]  %s1233_s17, 256, %s1235_s20, [#allocation3]  }
 0x711   :  { %1392 = dma.done.wait [#allocation3], 256  }
 0x712   :  { %1393 = vsyncadd [#allocation3], 4294967040 }
 0x713   :  { %1242 = vsyncpa [#allocation3], 1 }

</bundles_post_ra>
